<compile_context>
chip_gen: v7x
topology: tpu7x:2x2x1
jax: 0.10.0
libtpu: 0.0.40
codegen_flags: <defaults>
</compile_context>

<pallas_src>
import jax
import jax.numpy as jnp
from jax.experimental import pallas as pl
from jax.experimental.pallas import tpu as pltpu

# ---------------- small synthetic BERT config ----------------
VOCAB = 100
HIDDEN = 128
N_LAYERS = 2
N_HEADS = 2
HEAD_DIM = HIDDEN // N_HEADS
INTERMEDIATE = 256
MAX_POS = 32
NUM_LABELS = 8
CLS_PAD = 128                  # classifier output padded to one full 128-lane register
LN_EPS = 1e-12
SIDE_W = 3 * HIDDEN            # lane width of the packed side-parameter array
SIDE_ROWS_PER_LAYER = 8        # b_qkv, b_o, ln1_g, ln1_b, b_i, b_o2, ln2_g, ln2_b


# ---------------- the single fused Pallas kernel ----------------
def _bert_fused_kernel(x_ref, bias_ref, pool_ref, side_ref,
                       wh_ref, wo2_ref, clsw_ref, out_ref):
    f32, bf16 = jnp.float32, jnp.bfloat16
    H, I = HIDDEN, INTERMEDIATE
    scale = HEAD_DIM ** -0.5
    # contract both last dims: Q @ K^T on the MXU without materializing K^T
    dn_nt = (((1,), (1,)), ((), ()))

    def srow(r, width=HIDDEN):
        # static slice of the packed f32 side-parameter array -> (1, width)
        return side_ref[r:r + 1, 0:width]

    def layernorm(y, g, b):
        mean = jnp.mean(y, axis=-1, keepdims=True)
        var = jnp.mean(jnp.square(y - mean), axis=-1, keepdims=True)
        return (y - mean) * jax.lax.rsqrt(var + LN_EPS) * g + b

    def dot_bf16(a, w_bf16):
        # bf16 MXU operands, f32 accumulation.
        return jnp.dot(a.astype(bf16), w_bf16, preferred_element_type=f32)

    # embeddings LN (no residual -> no zero-array add)
    x = layernorm(x_ref[...], srow(0), srow(1))          # (B*S, H) f32
    bias = bias_ref[...]                                 # (B*S, B*S) additive mask

    for l in range(N_LAYERS):
        base = 3 + SIDE_ROWS_PER_LAYER * l
        w_l = wh_ref[l]                                  # (H, 3H|H|I) bf16: [Wq Wk Wv | Wo | Wi]
        w_qkv = w_l[:, 0:3 * H]
        w_o = w_l[:, 3 * H:4 * H]
        w_i = w_l[:, 4 * H:4 * H + I]

        # ---- fused QKV projection: one MXU pass per layer ----
        qkv = dot_bf16(x, w_qkv) + srow(base + 0, 3 * H)          # (B*S, 3H) f32

        # ---- self attention over all B*S rows at once ----
        # batch independence enforced by the block-diagonal additive bias.
        ctx_heads = []
        for h in range(N_HEADS):
            c0 = h * HEAD_DIM
            qh = qkv[:, c0:c0 + HEAD_DIM].astype(bf16)
            kh = qkv[:, H + c0:H + c0 + HEAD_DIM].astype(bf16)
            vh = qkv[:, 2 * H + c0:2 * H + c0 + HEAD_DIM].astype(bf16)
            s = jax.lax.dot_general(qh, kh, dn_nt,
                                    preferred_element_type=f32)   # (B*S, B*S)
            s = s * scale + bias
            s = s - jnp.max(s, axis=-1, keepdims=True)
            p = jnp.exp(s)
            p = p * pl.reciprocal(jnp.sum(p, axis=-1, keepdims=True),
                                  approx=True)
            ctx_heads.append(jnp.dot(p.astype(bf16), vh,
                                     preferred_element_type=f32))  # (B*S, Dh)
        ctx = jnp.concatenate(ctx_heads, axis=-1)                  # (B*S, H), lane concat
        attn_out = dot_bf16(ctx, w_o) + srow(base + 1)
        x = layernorm(attn_out + x, srow(base + 2), srow(base + 3))

        # ---- feed-forward ----
        hmid = dot_bf16(x, w_i) + srow(base + 4, I)
        # TODO(synk): HF BERT uses exact erf-GELU; tanh approximation kept here
        # for guaranteed Mosaic lowering (difference ~1e-3).
        hmid = jax.nn.gelu(hmid, approximate=True)
        ffn_out = dot_bf16(hmid, wo2_ref[l]) + srow(base + 5)
        x = layernorm(ffn_out + x, srow(base + 6), srow(base + 7))

    # ---- classifier: seq-mean commutes with the affine classifier ----
    # mean done as an MXU matmul against the (B, B*S) pooling matrix
    # (no XLU sublane reductions / concat).
    xm = jnp.dot(pool_ref[...], x.astype(bf16),
                 preferred_element_type=f32)                       # (B, H)
    logits = dot_bf16(xm, clsw_ref[...]) + srow(2, CLS_PAD)        # (B, CLS_PAD)
    out_ref[...] = logits.astype(out_ref.dtype)


def _full_spec(arr):
    nd = arr.ndim
    return pl.BlockSpec(arr.shape, lambda i, _nd=nd: (0,) * _nd)


def bert_fused_call(x_emb, attn_bias, pool, pk):
    batch = pool.shape[0]
    inputs = [x_emb, attn_bias, pool,
              pk["side"], pk["w_h"], pk["w_o2"], pk["cls_w"]]
    return pl.pallas_call(
        _bert_fused_kernel,
        out_shape=jax.ShapeDtypeStruct((batch, CLS_PAD), jnp.float32),
        grid=(1,),
        in_specs=[_full_spec(a) for a in inputs],
        out_specs=pl.BlockSpec((batch, CLS_PAD), lambda i: (0, 0)),
        compiler_params=pltpu.CompilerParams(
            dimension_semantics=("arbitrary",)),
    )(*inputs)


# ---------------- deterministic parameter init ----------------
def init_params(key):
    def normal(k, shape):
        return 0.02 * jax.random.normal(k, shape, dtype=jnp.float32)

    keys = iter(jax.random.split(key, 256))
    params = {
        "word_emb": normal(next(keys), (VOCAB, HIDDEN)),
        "pos_emb": normal(next(keys), (MAX_POS, HIDDEN)),
        "type_emb": normal(next(keys), (2, HIDDEN)),
        "emb_ln_g": jnp.ones((HIDDEN,), jnp.float32),
        "emb_ln_b": jnp.zeros((HIDDEN,), jnp.float32),
        "cls_w": normal(next(keys), (HIDDEN, NUM_LABELS)),
        "cls_b": jnp.zeros((NUM_LABELS,), jnp.float32),
        "layers": [],
    }
    for _ in range(N_LAYERS):
        params["layers"].append({
            "wq": normal(next(keys), (HIDDEN, HIDDEN)),
            "bq": jnp.zeros((HIDDEN,), jnp.float32),
            "wk": normal(next(keys), (HIDDEN, HIDDEN)),
            "bk": jnp.zeros((HIDDEN,), jnp.float32),
            "wv": normal(next(keys), (HIDDEN, HIDDEN)),
            "bv": jnp.zeros((HIDDEN,), jnp.float32),
            "wo": normal(next(keys), (HIDDEN, HIDDEN)),
            "bo": jnp.zeros((HIDDEN,), jnp.float32),
            "attn_ln_g": jnp.ones((HIDDEN,), jnp.float32),
            "attn_ln_b": jnp.zeros((HIDDEN,), jnp.float32),
            "wi": normal(next(keys), (HIDDEN, INTERMEDIATE)),
            "bi": jnp.zeros((INTERMEDIATE,), jnp.float32),
            "wo2": normal(next(keys), (INTERMEDIATE, HIDDEN)),
            "bo2": jnp.zeros((HIDDEN,), jnp.float32),
            "ffn_ln_g": jnp.ones((HIDDEN,), jnp.float32),
            "ffn_ln_b": jnp.zeros((HIDDEN,), jnp.float32),
        })
    return params


def pack_params(params):
    """One-time packing (hoisted out of the forward path):
       * all tiny f32 side params -> one (3 + 8L, 3H) array,
       * per-layer Wq|Wk|Wv|Wo|Wi -> one (L, H, 4H+I) bf16 array,
       * Wo2 stacked, classifier W padded to 128 lanes, bf16 for the MXU."""
    L = params["layers"]
    bf16 = jnp.bfloat16
    H, I = HIDDEN, INTERMEDIATE

    def pad_to(v, width=SIDE_W):
        return jnp.pad(v, (0, width - v.shape[0]))

    side_rows = [
        pad_to(params["emb_ln_g"]),                                     # row 0
        pad_to(params["emb_ln_b"]),                                     # row 1
        pad_to(jnp.pad(params["cls_b"], (0, CLS_PAD - NUM_LABELS))),    # row 2
    ]
    w_h_layers, w_o2_layers = [], []
    for l in L:
        side_rows += [
            jnp.concatenate([l["bq"], l["bk"], l["bv"]]),               # +0 (3H,)
            pad_to(l["bo"]),                                            # +1
            pad_to(l["attn_ln_g"]),                                     # +2
            pad_to(l["attn_ln_b"]),                                     # +3
            pad_to(l["bi"]),                                            # +4 (I -> 3H)
            pad_to(l["bo2"]),                                           # +5
            pad_to(l["ffn_ln_g"]),                                      # +6
            pad_to(l["ffn_ln_b"]),                                      # +7
        ]
        w_h_layers.append(jnp.concatenate(
            [l["wq"], l["wk"], l["wv"], l["wo"], l["wi"]], axis=1))     # (H, 4H+I)
        w_o2_layers.append(l["wo2"])                                    # (I, H)

    return {
        # embedding tables stay f32; gathers happen in plain JAX outside kernel
        "word_emb": params["word_emb"],
        "pos_emb": params["pos_emb"],
        "type_emb": params["type_emb"],
        "side": jnp.stack(side_rows, axis=0),                           # (3+8L, 3H) f32
        "w_h": jnp.stack(w_h_layers, axis=0).astype(bf16),              # (L, H, 4H+I)
        "w_o2": jnp.stack(w_o2_layers, axis=0).astype(bf16),            # (L, I, H)
        "cls_w": jnp.pad(params["cls_w"],
                         ((0, 0), (0, CLS_PAD - NUM_LABELS))).astype(bf16),
    }


# ---------------- forward (task_level == 'sentence') ----------------
def bert_tagger_forward(pk, text, att_mask):
    bsz, seq = text.shape

    # embeddings: word + position + token_type(0); gathers are plain-JAX glue.
    positions = jnp.arange(seq)
    x = (jnp.take(pk["word_emb"], text, axis=0)
         + pk["pos_emb"][positions][None, :, :]
         + pk["type_emb"][0][None, None, :])                     # (B, S, H)
    x = x.reshape(bsz * seq, HIDDEN).astype(jnp.float32)
    # nn.Dropout: eval-mode identity.

    # (B*S, B*S) additive attention bias: -1e4 for keys of another sentence
    # (block-diagonal), HF-style (1 - mask) * -1e4 for padded keys within it.
    sent_id = jnp.repeat(jnp.arange(bsz), seq)                   # (B*S,)
    block = (sent_id[:, None] == sent_id[None, :]).astype(jnp.float32)
    key_bias = ((1.0 - att_mask.astype(jnp.float32)) * -10000.0
                ).reshape(1, bsz * seq)
    attn_bias = block * key_bias + (block - 1.0) * 10000.0       # (B*S, B*S)

    # (B, B*S) pooling matrix: unmasked mean over all seq positions, matching
    # the reference `.mean(1)` (padding tokens included, as in PyTorch spec).
    pool = ((jnp.arange(bsz)[:, None] == sent_id[None, :])
            .astype(jnp.float32) / seq).astype(jnp.bfloat16)

    logits_pad = bert_fused_call(x, attn_bias, pool, pk)         # (B, 128)
    out = logits_pad[:, :NUM_LABELS]

    # .squeeze(0): PyTorch semantics — only squeezes if batch dim is 1.
    if out.shape[0] == 1:
        out = out[0]
    # TODO(synk): 'word' task_level branch (pooler_output path) not implemented.
    return out


if __name__ == "__main__":
    key = jax.random.PRNGKey(0)
    pkey, tkey = jax.random.split(key)
    # pack_params is hoisted out of the per-call forward path: executed once.
    pk = pack_params(init_params(pkey))

    B, S = 2, 8
    text = jax.random.randint(tkey, (B, S), 0, VOCAB, dtype=jnp.int32)
    att_mask = jnp.array([[1] * S, [1] * (S - 2) + [0, 0]], dtype=jnp.int32)

    fwd = jax.jit(bert_tagger_forward)
    out = jax.block_until_ready(fwd(pk, text, att_mask))
    assert out.shape == (B, NUM_LABELS)
    assert bool(jnp.all(jnp.isfinite(out)))
    print("KERNEL_OK")
</pallas_src>

<mosaic_0001>
module attributes {stable_mosaic.version = 11 : i64} {
  func.func @_bert_fused_kernel(%arg0: i32, %arg1: memref<16x128xf32, #tpu.memory_space<vmem>>, %arg2: memref<16x16xf32, #tpu.memory_space<vmem>>, %arg3: memref<2x16xbf16, #tpu.memory_space<vmem>>, %arg4: memref<19x384xf32, #tpu.memory_space<vmem>>, %arg5: memref<2x128x768xbf16, #tpu.memory_space<vmem>>, %arg6: memref<2x256x128xbf16, #tpu.memory_space<vmem>>, %arg7: memref<128x128xbf16, #tpu.memory_space<vmem>>, %arg8: memref<2x128xf32, #tpu.memory_space<vmem>>) attributes {dimension_semantics = [#tpu.dimension_semantics<arbitrary>], iteration_bounds = array<i64: 1>, scalar_prefetch = 0 : i64, scratch_operands = 0 : i64, tpu.core_type = #tpu.core_type<tc>, window_params = [{pipeline_mode = #tpu.pipeline_mode<synchronous>, transform_indices = @transform_0, window_bounds = array<i64: 16, 128>}, {pipeline_mode = #tpu.pipeline_mode<synchronous>, transform_indices = @transform_1, window_bounds = array<i64: 16, 16>}, {pipeline_mode = #tpu.pipeline_mode<synchronous>, transform_indices = @transform_2, window_bounds = array<i64: 2, 16>}, {pipeline_mode = #tpu.pipeline_mode<synchronous>, transform_indices = @transform_3, window_bounds = array<i64: 19, 384>}, {pipeline_mode = #tpu.pipeline_mode<synchronous>, transform_indices = @transform_4, window_bounds = array<i64: 2, 128, 768>}, {pipeline_mode = #tpu.pipeline_mode<synchronous>, transform_indices = @transform_5, window_bounds = array<i64: 2, 256, 128>}, {pipeline_mode = #tpu.pipeline_mode<synchronous>, transform_indices = @transform_6, window_bounds = array<i64: 128, 128>}, {pipeline_mode = #tpu.pipeline_mode<synchronous>, transform_indices = @transform_7, window_bounds = array<i64: 2, 128>}]} {
    %c0 = arith.constant 0 : index
    %c0_0 = arith.constant 0 : index
    %0 = vector.load %arg1[%c0, %c0_0] : memref<16x128xf32, #tpu.memory_space<vmem>>, vector<16x128xf32>
    %c0_1 = arith.constant 0 : index
    %c0_2 = arith.constant 0 : index
    %1 = vector.load %arg4[%c0_1, %c0_2] : memref<19x384xf32, #tpu.memory_space<vmem>>, vector<1x128xf32>
    %c1 = arith.constant 1 : index
    %c0_3 = arith.constant 0 : index
    %2 = vector.load %arg4[%c1, %c0_3] : memref<19x384xf32, #tpu.memory_space<vmem>>, vector<1x128xf32>
    %cst = arith.constant dense<0.000000e+00> : vector<16xf32>
    %3 = vector.multi_reduction <add>, %0, %cst [1] : vector<16x128xf32> to vector<16xf32>
    %4 = vector.shape_cast %3 : vector<16xf32> to vector<16x1xf32>
    %cst_4 = arith.constant 1.280000e+02 : f32
    %5 = vector.broadcast %cst_4 : f32 to vector<16x1xf32>
    %6 = arith.divf %4, %5 : vector<16x1xf32>
    %7 = vector.broadcast %6 : vector<16x1xf32> to vector<16x128xf32>
    %8 = arith.subf %0, %7 : vector<16x128xf32>
    %9 = arith.mulf %8, %8 : vector<16x128xf32>
    %cst_5 = arith.constant dense<0.000000e+00> : vector<16xf32>
    %10 = vector.multi_reduction <add>, %9, %cst_5 [1] : vector<16x128xf32> to vector<16xf32>
    %11 = vector.shape_cast %10 : vector<16xf32> to vector<16x1xf32>
    %cst_6 = arith.constant 1.280000e+02 : f32
    %12 = vector.broadcast %cst_6 : f32 to vector<16x1xf32>
    %13 = arith.divf %11, %12 : vector<16x1xf32>
    %14 = vector.broadcast %6 : vector<16x1xf32> to vector<16x128xf32>
    %15 = arith.subf %0, %14 : vector<16x128xf32>
    %cst_7 = arith.constant 9.99999996E-13 : f32
    %16 = vector.broadcast %cst_7 : f32 to vector<16x1xf32>
    %17 = arith.addf %13, %16 : vector<16x1xf32>
    %18 = math.rsqrt %17 : vector<16x1xf32>
    %19 = vector.broadcast %18 : vector<16x1xf32> to vector<16x128xf32>
    %20 = arith.mulf %15, %19 : vector<16x128xf32>
    %21 = vector.broadcast %1 : vector<1x128xf32> to vector<16x128xf32>
    %22 = arith.mulf %20, %21 : vector<16x128xf32>
    %23 = vector.broadcast %2 : vector<1x128xf32> to vector<16x128xf32>
    %24 = arith.addf %22, %23 : vector<16x128xf32>
    %c0_8 = arith.constant 0 : index
    %c0_9 = arith.constant 0 : index
    %25 = vector.load %arg2[%c0_8, %c0_9] : memref<16x16xf32, #tpu.memory_space<vmem>>, vector<16x16xf32>
    %c0_10 = arith.constant 0 : index
    %c0_11 = arith.constant 0 : index
    %c0_12 = arith.constant 0 : index
    %26 = vector.load %arg5[%c0_10, %c0_11, %c0_12] : memref<2x128x768xbf16, #tpu.memory_space<vmem>>, vector<1x128x768xbf16>
    %27 = vector.shape_cast %26 : vector<1x128x768xbf16> to vector<128x768xbf16>
    %28 = vector.extract_strided_slice %27 {offsets = [0, 0], sizes = [128, 384], strides = [1, 1]} : vector<128x768xbf16> to vector<128x384xbf16>
    %29 = vector.extract_strided_slice %27 {offsets = [0, 384], sizes = [128, 128], strides = [1, 1]} : vector<128x768xbf16> to vector<128x128xbf16>
    %30 = vector.extract_strided_slice %27 {offsets = [0, 512], sizes = [128, 256], strides = [1, 1]} : vector<128x768xbf16> to vector<128x256xbf16>
    %31 = arith.truncf %24 : vector<16x128xf32> to vector<16x128xbf16>
    %cst_13 = arith.constant dense<0.000000e+00> : vector<16x384xf32>
    %32 = tpu.matmul %31, %28, %cst_13 {dimension_numbers = #tpu.dot_dimension_numbers<[1], [0], [0], [1], [0, 0, 1, 1], [], []>} : vector<16x128xbf16>, vector<128x384xbf16>, vector<16x384xf32> -> vector<16x384xf32>
    %c3 = arith.constant 3 : index
    %c0_14 = arith.constant 0 : index
    %33 = vector.load %arg4[%c3, %c0_14] : memref<19x384xf32, #tpu.memory_space<vmem>>, vector<1x384xf32>
    %34 = vector.broadcast %33 : vector<1x384xf32> to vector<16x384xf32>
    %35 = arith.addf %32, %34 : vector<16x384xf32>
    %36 = vector.extract_strided_slice %35 {offsets = [0, 0], sizes = [16, 64], strides = [1, 1]} : vector<16x384xf32> to vector<16x64xf32>
    %37 = arith.truncf %36 : vector<16x64xf32> to vector<16x64xbf16>
    %38 = vector.extract_strided_slice %35 {offsets = [0, 128], sizes = [16, 64], strides = [1, 1]} : vector<16x384xf32> to vector<16x64xf32>
    %39 = arith.truncf %38 : vector<16x64xf32> to vector<16x64xbf16>
    %40 = vector.extract_strided_slice %35 {offsets = [0, 256], sizes = [16, 64], strides = [1, 1]} : vector<16x384xf32> to vector<16x64xf32>
    %41 = arith.truncf %40 : vector<16x64xf32> to vector<16x64xbf16>
    %cst_15 = arith.constant dense<0.000000e+00> : vector<16x16xf32>
    %42 = tpu.matmul %37, %39, %cst_15 {dimension_numbers = #tpu.dot_dimension_numbers<[1], [1], [0], [0], [0, 0, 1, 0], [], []>} : vector<16x64xbf16>, vector<16x64xbf16>, vector<16x16xf32> -> vector<16x16xf32>
    %cst_16 = arith.constant 1.250000e-01 : f32
    %43 = vector.broadcast %cst_16 : f32 to vector<16x16xf32>
    %44 = arith.mulf %42, %43 : vector<16x16xf32>
    %45 = arith.addf %44, %25 : vector<16x16xf32>
    %cst_17 = arith.constant dense<0xFF800000> : vector<16xf32>
    %46 = vector.multi_reduction <maximumf>, %45, %cst_17 [1] : vector<16x16xf32> to vector<16xf32>
    %47 = vector.shape_cast %46 : vector<16xf32> to vector<16x1xf32>
    %48 = vector.broadcast %47 : vector<16x1xf32> to vector<16x16xf32>
    %49 = arith.subf %45, %48 : vector<16x16xf32>
    %50 = math.exp %49 : vector<16x16xf32>
    %cst_18 = arith.constant dense<0.000000e+00> : vector<16xf32>
    %51 = vector.multi_reduction <add>, %50, %cst_18 [1] : vector<16x16xf32> to vector<16xf32>
    %52 = vector.shape_cast %51 : vector<16xf32> to vector<16x1xf32>
    %53 = tpu.reciprocal %52 {approx = true} : vector<16x1xf32> -> vector<16x1xf32>
    %54 = vector.broadcast %53 : vector<16x1xf32> to vector<16x16xf32>
    %55 = arith.mulf %50, %54 : vector<16x16xf32>
    %56 = arith.truncf %55 : vector<16x16xf32> to vector<16x16xbf16>
    %cst_19 = arith.constant dense<0.000000e+00> : vector<16x64xf32>
    %57 = tpu.matmul %56, %41, %cst_19 {dimension_numbers = #tpu.dot_dimension_numbers<[1], [0], [0], [1], [0, 0, 1, 1], [], []>} : vector<16x16xbf16>, vector<16x64xbf16>, vector<16x64xf32> -> vector<16x64xf32>
    %58 = vector.extract_strided_slice %35 {offsets = [0, 64], sizes = [16, 64], strides = [1, 1]} : vector<16x384xf32> to vector<16x64xf32>
    %59 = arith.truncf %58 : vector<16x64xf32> to vector<16x64xbf16>
    %60 = vector.extract_strided_slice %35 {offsets = [0, 192], sizes = [16, 64], strides = [1, 1]} : vector<16x384xf32> to vector<16x64xf32>
    %61 = arith.truncf %60 : vector<16x64xf32> to vector<16x64xbf16>
    %62 = vector.extract_strided_slice %35 {offsets = [0, 320], sizes = [16, 64], strides = [1, 1]} : vector<16x384xf32> to vector<16x64xf32>
    %63 = arith.truncf %62 : vector<16x64xf32> to vector<16x64xbf16>
    %cst_20 = arith.constant dense<0.000000e+00> : vector<16x16xf32>
    %64 = tpu.matmul %59, %61, %cst_20 {dimension_numbers = #tpu.dot_dimension_numbers<[1], [1], [0], [0], [0, 0, 1, 0], [], []>} : vector<16x64xbf16>, vector<16x64xbf16>, vector<16x16xf32> -> vector<16x16xf32>
    %cst_21 = arith.constant 1.250000e-01 : f32
    %65 = vector.broadcast %cst_21 : f32 to vector<16x16xf32>
    %66 = arith.mulf %64, %65 : vector<16x16xf32>
    %67 = arith.addf %66, %25 : vector<16x16xf32>
    %cst_22 = arith.constant dense<0xFF800000> : vector<16xf32>
    %68 = vector.multi_reduction <maximumf>, %67, %cst_22 [1] : vector<16x16xf32> to vector<16xf32>
    %69 = vector.shape_cast %68 : vector<16xf32> to vector<16x1xf32>
    %70 = vector.broadcast %69 : vector<16x1xf32> to vector<16x16xf32>
    %71 = arith.subf %67, %70 : vector<16x16xf32>
    %72 = math.exp %71 : vector<16x16xf32>
    %cst_23 = arith.constant dense<0.000000e+00> : vector<16xf32>
    %73 = vector.multi_reduction <add>, %72, %cst_23 [1] : vector<16x16xf32> to vector<16xf32>
    %74 = vector.shape_cast %73 : vector<16xf32> to vector<16x1xf32>
    %75 = tpu.reciprocal %74 {approx = true} : vector<16x1xf32> -> vector<16x1xf32>
    %76 = vector.broadcast %75 : vector<16x1xf32> to vector<16x16xf32>
    %77 = arith.mulf %72, %76 : vector<16x16xf32>
    %78 = arith.truncf %77 : vector<16x16xf32> to vector<16x16xbf16>
    %cst_24 = arith.constant dense<0.000000e+00> : vector<16x64xf32>
    %79 = tpu.matmul %78, %63, %cst_24 {dimension_numbers = #tpu.dot_dimension_numbers<[1], [0], [0], [1], [0, 0, 1, 1], [], []>} : vector<16x16xbf16>, vector<16x64xbf16>, vector<16x64xf32> -> vector<16x64xf32>
    %80 = tpu.concatenate %57, %79 in 1 : vector<16x64xf32>, vector<16x64xf32> -> vector<16x128xf32>
    %81 = arith.truncf %80 : vector<16x128xf32> to vector<16x128xbf16>
    %cst_25 = arith.constant dense<0.000000e+00> : vector<16x128xf32>
    %82 = tpu.matmul %81, %29, %cst_25 {dimension_numbers = #tpu.dot_dimension_numbers<[1], [0], [0], [1], [0, 0, 1, 1], [], []>} : vector<16x128xbf16>, vector<128x128xbf16>, vector<16x128xf32> -> vector<16x128xf32>
    %c4 = arith.constant 4 : index
    %c0_26 = arith.constant 0 : index
    %83 = vector.load %arg4[%c4, %c0_26] : memref<19x384xf32, #tpu.memory_space<vmem>>, vector<1x128xf32>
    %84 = vector.broadcast %83 : vector<1x128xf32> to vector<16x128xf32>
    %85 = arith.addf %82, %84 : vector<16x128xf32>
    %86 = arith.addf %85, %24 : vector<16x128xf32>
    %c5 = arith.constant 5 : index
    %c0_27 = arith.constant 0 : index
    %87 = vector.load %arg4[%c5, %c0_27] : memref<19x384xf32, #tpu.memory_space<vmem>>, vector<1x128xf32>
    %c6 = arith.constant 6 : index
    %c0_28 = arith.constant 0 : index
    %88 = vector.load %arg4[%c6, %c0_28] : memref<19x384xf32, #tpu.memory_space<vmem>>, vector<1x128xf32>
    %cst_29 = arith.constant dense<0.000000e+00> : vector<16xf32>
    %89 = vector.multi_reduction <add>, %86, %cst_29 [1] : vector<16x128xf32> to vector<16xf32>
    %90 = vector.shape_cast %89 : vector<16xf32> to vector<16x1xf32>
    %cst_30 = arith.constant 1.280000e+02 : f32
    %91 = vector.broadcast %cst_30 : f32 to vector<16x1xf32>
    %92 = arith.divf %90, %91 : vector<16x1xf32>
    %93 = vector.broadcast %92 : vector<16x1xf32> to vector<16x128xf32>
    %94 = arith.subf %86, %93 : vector<16x128xf32>
    %95 = arith.mulf %94, %94 : vector<16x128xf32>
    %cst_31 = arith.constant dense<0.000000e+00> : vector<16xf32>
    %96 = vector.multi_reduction <add>, %95, %cst_31 [1] : vector<16x128xf32> to vector<16xf32>
    %97 = vector.shape_cast %96 : vector<16xf32> to vector<16x1xf32>
    %cst_32 = arith.constant 1.280000e+02 : f32
    %98 = vector.broadcast %cst_32 : f32 to vector<16x1xf32>
    %99 = arith.divf %97, %98 : vector<16x1xf32>
    %100 = vector.broadcast %92 : vector<16x1xf32> to vector<16x128xf32>
    %101 = arith.subf %86, %100 : vector<16x128xf32>
    %cst_33 = arith.constant 9.99999996E-13 : f32
    %102 = vector.broadcast %cst_33 : f32 to vector<16x1xf32>
    %103 = arith.addf %99, %102 : vector<16x1xf32>
    %104 = math.rsqrt %103 : vector<16x1xf32>
    %105 = vector.broadcast %104 : vector<16x1xf32> to vector<16x128xf32>
    %106 = arith.mulf %101, %105 : vector<16x128xf32>
    %107 = vector.broadcast %87 : vector<1x128xf32> to vector<16x128xf32>
    %108 = arith.mulf %106, %107 : vector<16x128xf32>
    %109 = vector.broadcast %88 : vector<1x128xf32> to vector<16x128xf32>
    %110 = arith.addf %108, %109 : vector<16x128xf32>
    %111 = arith.truncf %110 : vector<16x128xf32> to vector<16x128xbf16>
    %cst_34 = arith.constant dense<0.000000e+00> : vector<16x256xf32>
    %112 = tpu.matmul %111, %30, %cst_34 {dimension_numbers = #tpu.dot_dimension_numbers<[1], [0], [0], [1], [0, 0, 1, 1], [], []>} : vector<16x128xbf16>, vector<128x256xbf16>, vector<16x256xf32> -> vector<16x256xf32>
    %c7 = arith.constant 7 : index
    %c0_35 = arith.constant 0 : index
    %113 = vector.load %arg4[%c7, %c0_35] : memref<19x384xf32, #tpu.memory_space<vmem>>, vector<1x256xf32>
    %114 = vector.broadcast %113 : vector<1x256xf32> to vector<16x256xf32>
    %115 = arith.addf %112, %114 : vector<16x256xf32>
    %116 = arith.mulf %115, %115 : vector<16x256xf32>
    %117 = arith.mulf %115, %116 : vector<16x256xf32>
    %cst_36 = arith.constant 4.471500e-02 : f32
    %118 = vector.broadcast %cst_36 : f32 to vector<16x256xf32>
    %119 = arith.mulf %118, %117 : vector<16x256xf32>
    %120 = arith.addf %115, %119 : vector<16x256xf32>
    %cst_37 = arith.constant 0.797884583 : f32
    %121 = vector.broadcast %cst_37 : f32 to vector<16x256xf32>
    %122 = arith.mulf %121, %120 : vector<16x256xf32>
    %123 = math.tanh %122 : vector<16x256xf32>
    %cst_38 = arith.constant 1.000000e+00 : f32
    %124 = vector.broadcast %cst_38 : f32 to vector<16x256xf32>
    %125 = arith.addf %124, %123 : vector<16x256xf32>
    %cst_39 = arith.constant 5.000000e-01 : f32
    %126 = vector.broadcast %cst_39 : f32 to vector<16x256xf32>
    %127 = arith.mulf %126, %125 : vector<16x256xf32>
    %128 = arith.mulf %115, %127 : vector<16x256xf32>
    %c0_40 = arith.constant 0 : index
    %c0_41 = arith.constant 0 : index
    %c0_42 = arith.constant 0 : index
    %129 = vector.load %arg6[%c0_40, %c0_41, %c0_42] : memref<2x256x128xbf16, #tpu.memory_space<vmem>>, vector<1x256x128xbf16>
    %130 = vector.shape_cast %129 : vector<1x256x128xbf16> to vector<256x128xbf16>
    %131 = arith.truncf %128 : vector<16x256xf32> to vector<16x256xbf16>
    %cst_43 = arith.constant dense<0.000000e+00> : vector<16x128xf32>
    %132 = tpu.matmul %131, %130, %cst_43 {dimension_numbers = #tpu.dot_dimension_numbers<[1], [0], [0], [1], [0, 0, 1, 1], [], []>} : vector<16x256xbf16>, vector<256x128xbf16>, vector<16x128xf32> -> vector<16x128xf32>
    %c8 = arith.constant 8 : index
    %c0_44 = arith.constant 0 : index
    %133 = vector.load %arg4[%c8, %c0_44] : memref<19x384xf32, #tpu.memory_space<vmem>>, vector<1x128xf32>
    %134 = vector.broadcast %133 : vector<1x128xf32> to vector<16x128xf32>
    %135 = arith.addf %132, %134 : vector<16x128xf32>
    %136 = arith.addf %135, %110 : vector<16x128xf32>
    %c9 = arith.constant 9 : index
    %c0_45 = arith.constant 0 : index
    %137 = vector.load %arg4[%c9, %c0_45] : memref<19x384xf32, #tpu.memory_space<vmem>>, vector<1x128xf32>
    %c10 = arith.constant 10 : index
    %c0_46 = arith.constant 0 : index
    %138 = vector.load %arg4[%c10, %c0_46] : memref<19x384xf32, #tpu.memory_space<vmem>>, vector<1x128xf32>
    %cst_47 = arith.constant dense<0.000000e+00> : vector<16xf32>
    %139 = vector.multi_reduction <add>, %136, %cst_47 [1] : vector<16x128xf32> to vector<16xf32>
    %140 = vector.shape_cast %139 : vector<16xf32> to vector<16x1xf32>
    %cst_48 = arith.constant 1.280000e+02 : f32
    %141 = vector.broadcast %cst_48 : f32 to vector<16x1xf32>
    %142 = arith.divf %140, %141 : vector<16x1xf32>
    %143 = vector.broadcast %142 : vector<16x1xf32> to vector<16x128xf32>
    %144 = arith.subf %136, %143 : vector<16x128xf32>
    %145 = arith.mulf %144, %144 : vector<16x128xf32>
    %cst_49 = arith.constant dense<0.000000e+00> : vector<16xf32>
    %146 = vector.multi_reduction <add>, %145, %cst_49 [1] : vector<16x128xf32> to vector<16xf32>
    %147 = vector.shape_cast %146 : vector<16xf32> to vector<16x1xf32>
    %cst_50 = arith.constant 1.280000e+02 : f32
    %148 = vector.broadcast %cst_50 : f32 to vector<16x1xf32>
    %149 = arith.divf %147, %148 : vector<16x1xf32>
    %150 = vector.broadcast %142 : vector<16x1xf32> to vector<16x128xf32>
    %151 = arith.subf %136, %150 : vector<16x128xf32>
    %cst_51 = arith.constant 9.99999996E-13 : f32
    %152 = vector.broadcast %cst_51 : f32 to vector<16x1xf32>
    %153 = arith.addf %149, %152 : vector<16x1xf32>
    %154 = math.rsqrt %153 : vector<16x1xf32>
    %155 = vector.broadcast %154 : vector<16x1xf32> to vector<16x128xf32>
    %156 = arith.mulf %151, %155 : vector<16x128xf32>
    %157 = vector.broadcast %137 : vector<1x128xf32> to vector<16x128xf32>
    %158 = arith.mulf %156, %157 : vector<16x128xf32>
    %159 = vector.broadcast %138 : vector<1x128xf32> to vector<16x128xf32>
    %160 = arith.addf %158, %159 : vector<16x128xf32>
    %c1_52 = arith.constant 1 : index
    %c0_53 = arith.constant 0 : index
    %c0_54 = arith.constant 0 : index
    %161 = vector.load %arg5[%c1_52, %c0_53, %c0_54] : memref<2x128x768xbf16, #tpu.memory_space<vmem>>, vector<1x128x768xbf16>
    %162 = vector.shape_cast %161 : vector<1x128x768xbf16> to vector<128x768xbf16>
    %163 = vector.extract_strided_slice %162 {offsets = [0, 0], sizes = [128, 384], strides = [1, 1]} : vector<128x768xbf16> to vector<128x384xbf16>
    %164 = vector.extract_strided_slice %162 {offsets = [0, 384], sizes = [128, 128], strides = [1, 1]} : vector<128x768xbf16> to vector<128x128xbf16>
    %165 = vector.extract_strided_slice %162 {offsets = [0, 512], sizes = [128, 256], strides = [1, 1]} : vector<128x768xbf16> to vector<128x256xbf16>
    %166 = arith.truncf %160 : vector<16x128xf32> to vector<16x128xbf16>
    %cst_55 = arith.constant dense<0.000000e+00> : vector<16x384xf32>
    %167 = tpu.matmul %166, %163, %cst_55 {dimension_numbers = #tpu.dot_dimension_numbers<[1], [0], [0], [1], [0, 0, 1, 1], [], []>} : vector<16x128xbf16>, vector<128x384xbf16>, vector<16x384xf32> -> vector<16x384xf32>
    %c11 = arith.constant 11 : index
    %c0_56 = arith.constant 0 : index
    %168 = vector.load %arg4[%c11, %c0_56] : memref<19x384xf32, #tpu.memory_space<vmem>>, vector<1x384xf32>
    %169 = vector.broadcast %168 : vector<1x384xf32> to vector<16x384xf32>
    %170 = arith.addf %167, %169 : vector<16x384xf32>
    %171 = vector.extract_strided_slice %170 {offsets = [0, 0], sizes = [16, 64], strides = [1, 1]} : vector<16x384xf32> to vector<16x64xf32>
    %172 = arith.truncf %171 : vector<16x64xf32> to vector<16x64xbf16>
    %173 = vector.extract_strided_slice %170 {offsets = [0, 128], sizes = [16, 64], strides = [1, 1]} : vector<16x384xf32> to vector<16x64xf32>
    %174 = arith.truncf %173 : vector<16x64xf32> to vector<16x64xbf16>
    %175 = vector.extract_strided_slice %170 {offsets = [0, 256], sizes = [16, 64], strides = [1, 1]} : vector<16x384xf32> to vector<16x64xf32>
    %176 = arith.truncf %175 : vector<16x64xf32> to vector<16x64xbf16>
    %cst_57 = arith.constant dense<0.000000e+00> : vector<16x16xf32>
    %177 = tpu.matmul %172, %174, %cst_57 {dimension_numbers = #tpu.dot_dimension_numbers<[1], [1], [0], [0], [0, 0, 1, 0], [], []>} : vector<16x64xbf16>, vector<16x64xbf16>, vector<16x16xf32> -> vector<16x16xf32>
    %cst_58 = arith.constant 1.250000e-01 : f32
    %178 = vector.broadcast %cst_58 : f32 to vector<16x16xf32>
    %179 = arith.mulf %177, %178 : vector<16x16xf32>
    %180 = arith.addf %179, %25 : vector<16x16xf32>
    %cst_59 = arith.constant dense<0xFF800000> : vector<16xf32>
    %181 = vector.multi_reduction <maximumf>, %180, %cst_59 [1] : vector<16x16xf32> to vector<16xf32>
    %182 = vector.shape_cast %181 : vector<16xf32> to vector<16x1xf32>
    %183 = vector.broadcast %182 : vector<16x1xf32> to vector<16x16xf32>
    %184 = arith.subf %180, %183 : vector<16x16xf32>
    %185 = math.exp %184 : vector<16x16xf32>
    %cst_60 = arith.constant dense<0.000000e+00> : vector<16xf32>
    %186 = vector.multi_reduction <add>, %185, %cst_60 [1] : vector<16x16xf32> to vector<16xf32>
    %187 = vector.shape_cast %186 : vector<16xf32> to vector<16x1xf32>
    %188 = tpu.reciprocal %187 {approx = true} : vector<16x1xf32> -> vector<16x1xf32>
    %189 = vector.broadcast %188 : vector<16x1xf32> to vector<16x16xf32>
    %190 = arith.mulf %185, %189 : vector<16x16xf32>
    %191 = arith.truncf %190 : vector<16x16xf32> to vector<16x16xbf16>
    %cst_61 = arith.constant dense<0.000000e+00> : vector<16x64xf32>
    %192 = tpu.matmul %191, %176, %cst_61 {dimension_numbers = #tpu.dot_dimension_numbers<[1], [0], [0], [1], [0, 0, 1, 1], [], []>} : vector<16x16xbf16>, vector<16x64xbf16>, vector<16x64xf32> -> vector<16x64xf32>
    %193 = vector.extract_strided_slice %170 {offsets = [0, 64], sizes = [16, 64], strides = [1, 1]} : vector<16x384xf32> to vector<16x64xf32>
    %194 = arith.truncf %193 : vector<16x64xf32> to vector<16x64xbf16>
    %195 = vector.extract_strided_slice %170 {offsets = [0, 192], sizes = [16, 64], strides = [1, 1]} : vector<16x384xf32> to vector<16x64xf32>
    %196 = arith.truncf %195 : vector<16x64xf32> to vector<16x64xbf16>
    %197 = vector.extract_strided_slice %170 {offsets = [0, 320], sizes = [16, 64], strides = [1, 1]} : vector<16x384xf32> to vector<16x64xf32>
    %198 = arith.truncf %197 : vector<16x64xf32> to vector<16x64xbf16>
    %cst_62 = arith.constant dense<0.000000e+00> : vector<16x16xf32>
    %199 = tpu.matmul %194, %196, %cst_62 {dimension_numbers = #tpu.dot_dimension_numbers<[1], [1], [0], [0], [0, 0, 1, 0], [], []>} : vector<16x64xbf16>, vector<16x64xbf16>, vector<16x16xf32> -> vector<16x16xf32>
    %cst_63 = arith.constant 1.250000e-01 : f32
    %200 = vector.broadcast %cst_63 : f32 to vector<16x16xf32>
    %201 = arith.mulf %199, %200 : vector<16x16xf32>
    %202 = arith.addf %201, %25 : vector<16x16xf32>
    %cst_64 = arith.constant dense<0xFF800000> : vector<16xf32>
    %203 = vector.multi_reduction <maximumf>, %202, %cst_64 [1] : vector<16x16xf32> to vector<16xf32>
    %204 = vector.shape_cast %203 : vector<16xf32> to vector<16x1xf32>
    %205 = vector.broadcast %204 : vector<16x1xf32> to vector<16x16xf32>
    %206 = arith.subf %202, %205 : vector<16x16xf32>
    %207 = math.exp %206 : vector<16x16xf32>
    %cst_65 = arith.constant dense<0.000000e+00> : vector<16xf32>
    %208 = vector.multi_reduction <add>, %207, %cst_65 [1] : vector<16x16xf32> to vector<16xf32>
    %209 = vector.shape_cast %208 : vector<16xf32> to vector<16x1xf32>
    %210 = tpu.reciprocal %209 {approx = true} : vector<16x1xf32> -> vector<16x1xf32>
    %211 = vector.broadcast %210 : vector<16x1xf32> to vector<16x16xf32>
    %212 = arith.mulf %207, %211 : vector<16x16xf32>
    %213 = arith.truncf %212 : vector<16x16xf32> to vector<16x16xbf16>
    %cst_66 = arith.constant dense<0.000000e+00> : vector<16x64xf32>
    %214 = tpu.matmul %213, %198, %cst_66 {dimension_numbers = #tpu.dot_dimension_numbers<[1], [0], [0], [1], [0, 0, 1, 1], [], []>} : vector<16x16xbf16>, vector<16x64xbf16>, vector<16x64xf32> -> vector<16x64xf32>
    %215 = tpu.concatenate %192, %214 in 1 : vector<16x64xf32>, vector<16x64xf32> -> vector<16x128xf32>
    %216 = arith.truncf %215 : vector<16x128xf32> to vector<16x128xbf16>
    %cst_67 = arith.constant dense<0.000000e+00> : vector<16x128xf32>
    %217 = tpu.matmul %216, %164, %cst_67 {dimension_numbers = #tpu.dot_dimension_numbers<[1], [0], [0], [1], [0, 0, 1, 1], [], []>} : vector<16x128xbf16>, vector<128x128xbf16>, vector<16x128xf32> -> vector<16x128xf32>
    %c12 = arith.constant 12 : index
    %c0_68 = arith.constant 0 : index
    %218 = vector.load %arg4[%c12, %c0_68] : memref<19x384xf32, #tpu.memory_space<vmem>>, vector<1x128xf32>
    %219 = vector.broadcast %218 : vector<1x128xf32> to vector<16x128xf32>
    %220 = arith.addf %217, %219 : vector<16x128xf32>
    %221 = arith.addf %220, %160 : vector<16x128xf32>
    %c13 = arith.constant 13 : index
    %c0_69 = arith.constant 0 : index
    %222 = vector.load %arg4[%c13, %c0_69] : memref<19x384xf32, #tpu.memory_space<vmem>>, vector<1x128xf32>
    %c14 = arith.constant 14 : index
    %c0_70 = arith.constant 0 : index
    %223 = vector.load %arg4[%c14, %c0_70] : memref<19x384xf32, #tpu.memory_space<vmem>>, vector<1x128xf32>
    %cst_71 = arith.constant dense<0.000000e+00> : vector<16xf32>
    %224 = vector.multi_reduction <add>, %221, %cst_71 [1] : vector<16x128xf32> to vector<16xf32>
    %225 = vector.shape_cast %224 : vector<16xf32> to vector<16x1xf32>
    %cst_72 = arith.constant 1.280000e+02 : f32
    %226 = vector.broadcast %cst_72 : f32 to vector<16x1xf32>
    %227 = arith.divf %225, %226 : vector<16x1xf32>
    %228 = vector.broadcast %227 : vector<16x1xf32> to vector<16x128xf32>
    %229 = arith.subf %221, %228 : vector<16x128xf32>
    %230 = arith.mulf %229, %229 : vector<16x128xf32>
    %cst_73 = arith.constant dense<0.000000e+00> : vector<16xf32>
    %231 = vector.multi_reduction <add>, %230, %cst_73 [1] : vector<16x128xf32> to vector<16xf32>
    %232 = vector.shape_cast %231 : vector<16xf32> to vector<16x1xf32>
    %cst_74 = arith.constant 1.280000e+02 : f32
    %233 = vector.broadcast %cst_74 : f32 to vector<16x1xf32>
    %234 = arith.divf %232, %233 : vector<16x1xf32>
    %235 = vector.broadcast %227 : vector<16x1xf32> to vector<16x128xf32>
    %236 = arith.subf %221, %235 : vector<16x128xf32>
    %cst_75 = arith.constant 9.99999996E-13 : f32
    %237 = vector.broadcast %cst_75 : f32 to vector<16x1xf32>
    %238 = arith.addf %234, %237 : vector<16x1xf32>
    %239 = math.rsqrt %238 : vector<16x1xf32>
    %240 = vector.broadcast %239 : vector<16x1xf32> to vector<16x128xf32>
    %241 = arith.mulf %236, %240 : vector<16x128xf32>
    %242 = vector.broadcast %222 : vector<1x128xf32> to vector<16x128xf32>
    %243 = arith.mulf %241, %242 : vector<16x128xf32>
    %244 = vector.broadcast %223 : vector<1x128xf32> to vector<16x128xf32>
    %245 = arith.addf %243, %244 : vector<16x128xf32>
    %246 = arith.truncf %245 : vector<16x128xf32> to vector<16x128xbf16>
    %cst_76 = arith.constant dense<0.000000e+00> : vector<16x256xf32>
    %247 = tpu.matmul %246, %165, %cst_76 {dimension_numbers = #tpu.dot_dimension_numbers<[1], [0], [0], [1], [0, 0, 1, 1], [], []>} : vector<16x128xbf16>, vector<128x256xbf16>, vector<16x256xf32> -> vector<16x256xf32>
    %c15 = arith.constant 15 : index
    %c0_77 = arith.constant 0 : index
    %248 = vector.load %arg4[%c15, %c0_77] : memref<19x384xf32, #tpu.memory_space<vmem>>, vector<1x256xf32>
    %249 = vector.broadcast %248 : vector<1x256xf32> to vector<16x256xf32>
    %250 = arith.addf %247, %249 : vector<16x256xf32>
    %251 = arith.mulf %250, %250 : vector<16x256xf32>
    %252 = arith.mulf %250, %251 : vector<16x256xf32>
    %cst_78 = arith.constant 4.471500e-02 : f32
    %253 = vector.broadcast %cst_78 : f32 to vector<16x256xf32>
    %254 = arith.mulf %253, %252 : vector<16x256xf32>
    %255 = arith.addf %250, %254 : vector<16x256xf32>
    %cst_79 = arith.constant 0.797884583 : f32
    %256 = vector.broadcast %cst_79 : f32 to vector<16x256xf32>
    %257 = arith.mulf %256, %255 : vector<16x256xf32>
    %258 = math.tanh %257 : vector<16x256xf32>
    %cst_80 = arith.constant 1.000000e+00 : f32
    %259 = vector.broadcast %cst_80 : f32 to vector<16x256xf32>
    %260 = arith.addf %259, %258 : vector<16x256xf32>
    %cst_81 = arith.constant 5.000000e-01 : f32
    %261 = vector.broadcast %cst_81 : f32 to vector<16x256xf32>
    %262 = arith.mulf %261, %260 : vector<16x256xf32>
    %263 = arith.mulf %250, %262 : vector<16x256xf32>
    %c1_82 = arith.constant 1 : index
    %c0_83 = arith.constant 0 : index
    %c0_84 = arith.constant 0 : index
    %264 = vector.load %arg6[%c1_82, %c0_83, %c0_84] : memref<2x256x128xbf16, #tpu.memory_space<vmem>>, vector<1x256x128xbf16>
    %265 = vector.shape_cast %264 : vector<1x256x128xbf16> to vector<256x128xbf16>
    %266 = arith.truncf %263 : vector<16x256xf32> to vector<16x256xbf16>
    %cst_85 = arith.constant dense<0.000000e+00> : vector<16x128xf32>
    %267 = tpu.matmul %266, %265, %cst_85 {dimension_numbers = #tpu.dot_dimension_numbers<[1], [0], [0], [1], [0, 0, 1, 1], [], []>} : vector<16x256xbf16>, vector<256x128xbf16>, vector<16x128xf32> -> vector<16x128xf32>
    %c16 = arith.constant 16 : index
    %c0_86 = arith.constant 0 : index
    %268 = vector.load %arg4[%c16, %c0_86] : memref<19x384xf32, #tpu.memory_space<vmem>>, vector<1x128xf32>
    %269 = vector.broadcast %268 : vector<1x128xf32> to vector<16x128xf32>
    %270 = arith.addf %267, %269 : vector<16x128xf32>
    %271 = arith.addf %270, %245 : vector<16x128xf32>
    %c17 = arith.constant 17 : index
    %c0_87 = arith.constant 0 : index
    %272 = vector.load %arg4[%c17, %c0_87] : memref<19x384xf32, #tpu.memory_space<vmem>>, vector<1x128xf32>
    %c18 = arith.constant 18 : index
    %c0_88 = arith.constant 0 : index
    %273 = vector.load %arg4[%c18, %c0_88] : memref<19x384xf32, #tpu.memory_space<vmem>>, vector<1x128xf32>
    %cst_89 = arith.constant dense<0.000000e+00> : vector<16xf32>
    %274 = vector.multi_reduction <add>, %271, %cst_89 [1] : vector<16x128xf32> to vector<16xf32>
    %275 = vector.shape_cast %274 : vector<16xf32> to vector<16x1xf32>
    %cst_90 = arith.constant 1.280000e+02 : f32
    %276 = vector.broadcast %cst_90 : f32 to vector<16x1xf32>
    %277 = arith.divf %275, %276 : vector<16x1xf32>
    %278 = vector.broadcast %277 : vector<16x1xf32> to vector<16x128xf32>
    %279 = arith.subf %271, %278 : vector<16x128xf32>
    %280 = arith.mulf %279, %279 : vector<16x128xf32>
    %cst_91 = arith.constant dense<0.000000e+00> : vector<16xf32>
    %281 = vector.multi_reduction <add>, %280, %cst_91 [1] : vector<16x128xf32> to vector<16xf32>
    %282 = vector.shape_cast %281 : vector<16xf32> to vector<16x1xf32>
    %cst_92 = arith.constant 1.280000e+02 : f32
    %283 = vector.broadcast %cst_92 : f32 to vector<16x1xf32>
    %284 = arith.divf %282, %283 : vector<16x1xf32>
    %285 = vector.broadcast %277 : vector<16x1xf32> to vector<16x128xf32>
    %286 = arith.subf %271, %285 : vector<16x128xf32>
    %cst_93 = arith.constant 9.99999996E-13 : f32
    %287 = vector.broadcast %cst_93 : f32 to vector<16x1xf32>
    %288 = arith.addf %284, %287 : vector<16x1xf32>
    %289 = math.rsqrt %288 : vector<16x1xf32>
    %290 = vector.broadcast %289 : vector<16x1xf32> to vector<16x128xf32>
    %291 = arith.mulf %286, %290 : vector<16x128xf32>
    %292 = vector.broadcast %272 : vector<1x128xf32> to vector<16x128xf32>
    %293 = arith.mulf %291, %292 : vector<16x128xf32>
    %294 = vector.broadcast %273 : vector<1x128xf32> to vector<16x128xf32>
    %295 = arith.addf %293, %294 : vector<16x128xf32>
    %c0_94 = arith.constant 0 : index
    %c0_95 = arith.constant 0 : index
    %296 = vector.load %arg3[%c0_94, %c0_95] : memref<2x16xbf16, #tpu.memory_space<vmem>>, vector<2x16xbf16>
    %297 = arith.truncf %295 : vector<16x128xf32> to vector<16x128xbf16>
    %cst_96 = arith.constant dense<0.000000e+00> : vector<2x128xf32>
    %298 = tpu.matmul %296, %297, %cst_96 {dimension_numbers = #tpu.dot_dimension_numbers<[1], [0], [0], [1], [0, 0, 1, 1], [], []>} : vector<2x16xbf16>, vector<16x128xbf16>, vector<2x128xf32> -> vector<2x128xf32>
    %c0_97 = arith.constant 0 : index
    %c0_98 = arith.constant 0 : index
    %299 = vector.load %arg7[%c0_97, %c0_98] : memref<128x128xbf16, #tpu.memory_space<vmem>>, vector<128x128xbf16>
    %300 = arith.truncf %298 : vector<2x128xf32> to vector<2x128xbf16>
    %cst_99 = arith.constant dense<0.000000e+00> : vector<2x128xf32>
    %301 = tpu.matmul %300, %299, %cst_99 {dimension_numbers = #tpu.dot_dimension_numbers<[1], [0], [0], [1], [0, 0, 1, 1], [], []>} : vector<2x128xbf16>, vector<128x128xbf16>, vector<2x128xf32> -> vector<2x128xf32>
    %c2 = arith.constant 2 : index
    %c0_100 = arith.constant 0 : index
    %302 = vector.load %arg4[%c2, %c0_100] : memref<19x384xf32, #tpu.memory_space<vmem>>, vector<1x128xf32>
    %303 = vector.broadcast %302 : vector<1x128xf32> to vector<2x128xf32>
    %304 = arith.addf %301, %303 : vector<2x128xf32>
    %c0_101 = arith.constant 0 : index
    %c0_102 = arith.constant 0 : index
    %305 = vector.load %arg8[%c0_101, %c0_102] : memref<2x128xf32, #tpu.memory_space<vmem>>, vector<2x128xf32>
    tpu.vector_store %arg8[%c0_101, %c0_102], %304 {strides = array<i32>} : memref<2x128xf32, #tpu.memory_space<vmem>>, vector<2x128xf32>,
    return
  }
  func.func @transform_0(%arg0: i32) -> (i32, i32) {
    %c0_i32 = arith.constant 0 : i32
    %c0_i32_0 = arith.constant 0 : i32
    %c0_i32_1 = arith.constant 0 : i32
    return %c0_i32, %c0_i32_0 : i32, i32
  }
  func.func @transform_1(%arg0: i32) -> (i32, i32) {
    %c0_i32 = arith.constant 0 : i32
    %c0_i32_0 = arith.constant 0 : i32
    %c0_i32_1 = arith.constant 0 : i32
    return %c0_i32, %c0_i32_0 : i32, i32
  }
  func.func @transform_2(%arg0: i32) -> (i32, i32) {
    %c0_i32 = arith.constant 0 : i32
    %c0_i32_0 = arith.constant 0 : i32
    %c0_i32_1 = arith.constant 0 : i32
    return %c0_i32, %c0_i32_0 : i32, i32
  }
  func.func @transform_3(%arg0: i32) -> (i32, i32) {
    %c0_i32 = arith.constant 0 : i32
    %c0_i32_0 = arith.constant 0 : i32
    %c0_i32_1 = arith.constant 0 : i32
    return %c0_i32, %c0_i32_0 : i32, i32
  }
  func.func @transform_4(%arg0: i32) -> (i32, i32, i32) {
    %c0_i32 = arith.constant 0 : i32
    %c0_i32_0 = arith.constant 0 : i32
    %c0_i32_1 = arith.constant 0 : i32
    %c0_i32_2 = arith.constant 0 : i32
    return %c0_i32, %c0_i32_0, %c0_i32_1 : i32, i32, i32
  }
  func.func @transform_5(%arg0: i32) -> (i32, i32, i32) {
    %c0_i32 = arith.constant 0 : i32
    %c0_i32_0 = arith.constant 0 : i32
    %c0_i32_1 = arith.constant 0 : i32
    %c0_i32_2 = arith.constant 0 : i32
    return %c0_i32, %c0_i32_0, %c0_i32_1 : i32, i32, i32
  }
  func.func @transform_6(%arg0: i32) -> (i32, i32) {
    %c0_i32 = arith.constant 0 : i32
    %c0_i32_0 = arith.constant 0 : i32
    %c0_i32_1 = arith.constant 0 : i32
    return %c0_i32, %c0_i32_0 : i32, i32
  }
  func.func @transform_7(%arg0: i32) -> (i32, i32) {
    %c0_i32 = arith.constant 0 : i32
    %c0_i32_0 = arith.constant 0 : i32
    %c0_i32_1 = arith.constant 0 : i32
    return %c0_i32, %c0_i32_0 : i32, i32
  }
}

</mosaic_0001>

<bundles_post_ra>
// kernel: mul.10
= control target key start
LH: loop header
LB: loop body
LE: loop exit
PB: predicated region body
PF: predicated region fallthrough
CT: control target
= control target key end

     0   :  { %vm7_vm0 = vcmask 64512   ;;  %vm13_vm1 = vcmask 130112   ;;  %s39_s0 = inlined_call_operand.vmem [shape: f32[2,8], index: 0, kind: input, shape index: {}]   ;;  %s40_s1 = inlined_call_operand.vmem [shape: f32[16], index: 1, kind: output, shape index: {}]  }
   0x1   :  { %v4_v0 = vld [vmem:[%s39_s0] sm:$0x3]  ;;  %s22_s0 = smov 8  }
   0x2   :  { %5 = vst [vmem:[#allocation1] sm:$0x3] %v4_v0 }
   0x9   :  { %v10_v1 = vld [vmem:[#allocation1 + $0x1] sm:$0x1]   ;;  %v6_v2 = vld [vmem:[#allocation1] sm:$0x1]  }
   0xa   :  { %11 = vrot.lane.b32.xlu0 %v10_v1, %s22_s0  ;;  %8 = vst.msk [vmem:[#allocation0] sm:$0x1] %vm7_vm0, %v6_v2  }
  0x7c   :  { %v12_v3 = vpop.permute.xlu0 %11  }
  0x7d   :  { %14 = vst.msk [vmem:[#allocation0] sm:$0x1] %vm13_vm1, %v12_v3  }
  0x84   :  { %v18_v4 = vld [vmem:[#allocation0] sm:$0x1] }
  0x85   :  { %20 = vst [vmem:[%s40_s1] sm:$0x1] %v18_v4 }

// kernel: bert_tagger_forward.1
= control target key start
LH: loop header
LB: loop body
LE: loop exit
PB: predicated region body
PF: predicated region fallthrough
CT: control target
= control target key end

     0   :  { %12 = vsyncpa [#allocation3], 0  ;;  %s3545_s0 = inlined_call_operand.vmem [shape: f32[16,128], index: 0, kind: input, shape index: {}]   ;;  %s3546_s1 = inlined_call_operand.vmem [shape: f32[16,16], index: 1, kind: input, shape index: {}]   ;;  %s3547_s2 = inlined_call_operand.vmem [shape: bf16[2,16], index: 2, kind: input, shape index: {}]   ;;  %s3548_s3 = inlined_call_operand.hbm [shape: f32[19,384], index: 3, kind: input, shape index: {}]   ;;  %s3549_s4 = inlined_call_operand.hbm [shape: bf16[2,128,768], index: 4, kind: input, shape index: {}]   ;;  %s3550_s5 = inlined_call_operand.vmem [shape: bf16[2,256,128], index: 5, kind: input, shape index: {}]   ;;  %s3551_s6 = inlined_call_operand.hbm [shape: bf16[128,128], index: 6, kind: input, shape index: {}]   ;;  %s3552_s7 = inlined_call_operand.hbm [shape: f32[2,128], index: 7, kind: output, shape index: {}]  }
   0x1   :  { %13 = vsyncpa [#allocation6], 0 }
   0x2   :  { %14 = vsyncpa [#allocation4], 0  ;;  %s3115_s24 = smov [#allocation5]   ;;  %s3116_s26 = smov [#allocation2]  }
   0x3   :  { %s38_s25 = sshll.u32 %s3115_s24, 4  ;;  %s26_s27 = sshll.u32 %s3116_s26, 4  ;;  %s39_s25 = int_to_ptr.vmem [resolvable:$true] %s38_s25  ;;  %s3166_s27 = int_to_ptr.vmem [resolvable:$true] %s26_s27 }
   0x4   :  { %s3021_s30 = scalar_lea.hbm %s3549_s4, 12288 }
   0x5   :  { %p3022_p0 = scmp.ne.s32.totalorder %s3549_s4, %s3021_s30  ;;  %p3025_p1 = scmp.lt.u32.totalorder %s3021_s30, %s3549_s4 }
   0x7   :  { %p3027_p2 = pnand %p3025_p1, %p3022_p0 }
   0x9   :  { %3030 = shalt.err (!%p3027_p2)
}
   0xa   :  { %s3031_s12 = scalar_lea.vmem %s39_s25, 12288  ;;  %p3036_p4 = scmp.lt.s32.totalorder %s39_s25, %s39_s25 }
   0xb   :  { %p3032_p3 = scmp.ne.s32.totalorder %s39_s25, %s3031_s12  ;;  %p3037_p5 = scmp.lt.s32.totalorder %s3031_s12, %s3031_s12 }
   0xd   :  { %p3038_p6 = por %p3037_p5, %p3036_p4 }
   0xf   :  { %p3039_p7 = pnand %p3038_p6, %p3032_p3 }
  0x11   :  { %3042 = shalt.err (!%p3039_p7)
}
  0x12   :  { %s3117_s13 = smov 384   ;;  %s3118_s14 = smov 24  }
  0x13   :  { %44 = dma.hbm_to_vmem [thread:$0]  %s3549_s4, 12288, %s39_s25, [#allocation6], %s3117_s13, %s3117_s13, %s3118_s14  }
  0x14   :  { %s3043_s19 = scalar_lea.hbm %s3548_s3, 1152 }
  0x15   :  { %p3044_p8 = scmp.ne.s32.totalorder %s3548_s3, %s3043_s19  ;;  %p3047_p9 = scmp.lt.u32.totalorder %s3043_s19, %s3548_s3 }
  0x17   :  { %p3049_p10 = pnand %p3047_p9, %p3044_p8 }
  0x19   :  { %3052 = shalt.err (!%p3049_p10)
}
  0x1a   :  { %s3053_s24 = scalar_lea.vmem %s3166_s27, 1152  ;;  %p3058_p12 = scmp.lt.s32.totalorder %s3166_s27, %s3166_s27 }
  0x1b   :  { %p3054_p11 = scmp.ne.s32.totalorder %s3166_s27, %s3053_s24  ;;  %p3059_p13 = scmp.lt.s32.totalorder %s3053_s24, %s3053_s24 }
  0x1d   :  { %p3060_p0 = por %p3059_p13, %p3058_p12 }
  0x1f   :  { %p3061_p1 = pnand %p3060_p0, %p3054_p11 }
  0x21   :  { %3064 = shalt.err (!%p3061_p1)
}
  0x22   :  { %32 = dma.hbm_to_vmem [thread:$0]  %s3548_s3, 1152, %s3166_s27, [#allocation3], %s3117_s13, %s3117_s13, %s3118_s14  }
  0x23   :  { %s3119_s26 = smov [#allocation7]   ;;  %s3065_s8 = scalar_lea.hbm %s3551_s6, 1024 }
  0x24   :  { %s52_s28 = sshll.u32 %s3119_s26, 4  ;;  %p3066_p2 = scmp.ne.s32.totalorder %s3551_s6, %s3065_s8  ;;  %s53_s28 = int_to_ptr.vmem [resolvable:$true] %s52_s28 }
  0x25   :  { %p3069_p3 = scmp.lt.u32.totalorder %s3065_s8, %s3551_s6 }
  0x27   :  { %p3071_p4 = pnand %p3069_p3, %p3066_p2 }
  0x29   :  { %3074 = shalt.err (!%p3071_p4)
}
  0x2a   :  { %s3075_s15 = scalar_lea.vmem %s53_s28, 1024  ;;  %p3080_p6 = scmp.lt.s32.totalorder %s53_s28, %s53_s28 }
  0x2b   :  { %p3076_p5 = scmp.ne.s32.totalorder %s53_s28, %s3075_s15  ;;  %p3081_p7 = scmp.lt.s32.totalorder %s3075_s15, %s3075_s15 }
  0x2d   :  { %p3082_p8 = por %p3081_p7, %p3080_p6 }
  0x2f   :  { %p3083_p9 = pnand %p3082_p8, %p3076_p5 }
  0x31   :  { %3086 = shalt.err (!%p3083_p9)
}
  0x32   :  { %s3120_s3 = smov 64   ;;  %s3121_s27 = smov 4  }
  0x33   :  { %58 = dma.hbm_to_vmem [thread:$0]  %s3551_s6, 1024, %s53_s28, [#allocation6], %s3120_s3, %s3120_s3, %s3121_s27  }
  0x34   :  { %3109 = dma.done.wait [#allocation3], 1152  }
  0x35   :  { %3110 = vsyncadd [#allocation3], 4294966144 }
  0x36   :  { %3111 = dma.done.wait [#allocation6], 13312  }
  0x37   :  { %3112 = vsyncadd [#allocation6], 4294953984  ;;  %v69_v0 = vld [vmem:[%s3545_s0] sm:$0xff]  ;;  %v70_v1 = vld [vmem:[%s3545_s0 + $0x8] sm:$0xff]  ;;  %v3122_v4 = vmov 0.0   ;;  %v3123_v30 = vmov 0   ;;  %v154_v53 = vlaneseq }
  0x38   :  { %73 = vadd.xlane.f32.xlu0 %v69_v0  ;;  %v2769_v2 = vld [vmem:[#allocation5 + $0x4] ss:$24 sps:$4 sm:$0xff]   ;;  %v2771_v3 = vld [vmem:[#allocation5] ss:$24 sps:$4 sm:$0xff]   ;;  %2594 = vmatprep.subr.bf16.mxu1 %v3122_v4  ;;  %v2775_v6 = vld [vmem:[#allocation5 + $0x34] ss:$24 sps:$4 sm:$0xff]  }
  0x39   :  { %v2772_v5 = vld [vmem:[#allocation5 + $0x8] ss:$24 sps:$4 sm:$0xff]   ;;  %297 = vmatprep.subr.bf16.mxu0 %v2769_v2  ;;  %v2778_v16 = vld [vmem:[#allocation5 + $0x38] ss:$24 sps:$4 sm:$0xff]   ;;  %v2781_v17 = vld [vmem:[#allocation5 + $0x64] ss:$24 sps:$4 sm:$0xff]   ;;  %329 = vmatprep.mubr.bf16.mxu0 %v3123_v30 }
  0x3a   :  { %298 = vmatpush1.bf16.msra.mxu0 %v2771_v3  ;;  %2595 = vmatpush3.bf16.msra.mxu1 %v2772_v5  ;;  %v2777_v15 = vld [vmem:[#allocation5 + $0x30] ss:$24 sps:$4 sm:$0xff]   ;;  %v2783_v18 = vld [vmem:[#allocation5 + $0x60] ss:$24 sps:$4 sm:$0xff]   ;;  %v2787_v20 = vld [vmem:[#allocation5 + $0x94] ss:$24 sps:$4 sm:$0xff]  }
  0x3b   :  { %299 = vmatprep.subr.bf16.mxu0 %v2775_v6  ;;  %2596 = vmatprep.subr.bf16.mxu1 %v3122_v4  ;;  %v2784_v19 = vld [vmem:[#allocation5 + $0x68] ss:$24 sps:$4 sm:$0xff]   ;;  %v2790_v22 = vld [vmem:[#allocation5 + $0x98] ss:$24 sps:$4 sm:$0xff]   ;;  %v2793_v23 = vld [vmem:[#allocation5 + $0xc4] ss:$24 sps:$4 sm:$0xff]  }
  0x3c   :  { %75 = vadd.xlane.f32.xlu0 %v70_v1  ;;  %v2789_v21 = vld [vmem:[#allocation5 + $0x90] ss:$24 sps:$4 sm:$0xff]   ;;  %v2795_v24 = vld [vmem:[#allocation5 + $0xc0] ss:$24 sps:$4 sm:$0xff]   ;;  %v2799_v26 = vld [vmem:[#allocation5 + $0xf4] ss:$24 sps:$4 sm:$0xff]  }
  0x3d   :  { %v2796_v25 = vld [vmem:[#allocation5 + $0xc8] ss:$24 sps:$4 sm:$0xff]   ;;  %v2802_v28 = vld [vmem:[#allocation5 + $0xf8] ss:$24 sps:$4 sm:$0xff]   ;;  %v2805_v29 = vld [vmem:[#allocation5 + $0x124] ss:$24 sps:$4 sm:$0xff]  }
  0x3e   :  { %300 = vmatpush1.bf16.msra.mxu0 %v2777_v15  ;;  %2597 = vmatpush3.bf16.msra.mxu1 %v2778_v16  ;;  %v2801_v27 = vld [vmem:[#allocation5 + $0xf0] ss:$24 sps:$4 sm:$0xff]   ;;  %vm3124_vm0 = vmmov 0   ;;  %v2807_v31 = vld [vmem:[#allocation5 + $0x120] ss:$24 sps:$4 sm:$0xff]   ;;  %v3250_v54 = vshrl.u32 %v154_v53, 7 }
  0x3f   :  { %2598 = vmatprep.subr.bf16.mxu1 %v3122_v4  ;;  %301 = vmatprep.subr.bf16.mxu0 %v2781_v17  ;;  %v2808_v32 = vld [vmem:[#allocation5 + $0x128] ss:$24 sps:$4 sm:$0xff]   ;;  %v2811_v33 = vld [vmem:[#allocation5 + $0x154] ss:$24 sps:$4 sm:$0xff]   ;;  %v2814_v35 = vld [vmem:[#allocation5 + $0x158] ss:$24 sps:$4 sm:$0xff]  }
  0x40   :  { %2610 = vmatprep.mubr.msk.bf16.mxu1 %vm3124_vm0, %v3122_v4  ;;  %v2813_v34 = vld [vmem:[#allocation5 + $0x150] ss:$24 sps:$4 sm:$0xff]   ;;  %v71_v44 = vld [vmem:[#allocation2] ss:$0 sm:$0xff]  ;;  %v72_v48 = vld [vmem:[#allocation2 + $0x1] ss:$0 sm:$0xff] }
  0x41   :  { %v3253_v55 = vsub.s32 0, %v3250_v54  ;;  %v164_v56 = vsub.s32 2, %v3250_v54  ;;  %v152_v57 = vld [vmem:[#allocation2 + $0x3] ss:$8 sm:$0x7]  ;;  %v3257_v58 = vsub.s32 1, %v3250_v54 }
  0x42   :  { %302 = vmatpush1.bf16.msra.mxu0 %v2783_v18  ;;  %2599 = vmatpush3.bf16.msra.mxu1 %v2784_v19  ;;  %vm384_vm1 = vcmask 523264   ;;  %v2774_v19 = vld [vmem:[#allocation5 + $0xc] ss:$24 sps:$4 sm:$0xff]   ;;  %vm436_vm2 = vcmask 130048  }
  0x43   :  { %2600 = vmatprep.subr.bf16.mxu1 %v3122_v4  ;;  %303 = vmatprep.subr.bf16.mxu0 %v2787_v20  ;;  %v157_v59 = vrot.slane %v152_v57, %v3253_v55  ;;  %v165_v60 = vrot.slane %v152_v57, %v164_v56  ;;  %v161_v63 = vrot.slane %v152_v57, %v3257_v58 }
  0x46   :  { %304 = vmatpush1.bf16.msra.mxu0 %v2789_v21  ;;  %2601 = vmatpush3.bf16.msra.mxu1 %v2790_v22  ;;  %v2780_v21 = vld [vmem:[#allocation5 + $0x3c] ss:$24 sps:$4 sm:$0xff]   ;;  %v2786_v22 = vld [vmem:[#allocation5 + $0x6c] ss:$24 sps:$4 sm:$0xff]  }
  0x47   :  { %2602 = vmatprep.subr.bf16.mxu1 %v3122_v4  ;;  %305 = vmatprep.subr.bf16.mxu0 %v2793_v23  ;;  %v2792_v23 = vld [vmem:[#allocation5 + $0x9c] ss:$24 sps:$4 sm:$0xff]  }
  0x4a   :  { %306 = vmatpush1.bf16.msra.mxu0 %v2795_v24  ;;  %2603 = vmatpush3.bf16.msra.mxu1 %v2796_v25  ;;  %v2798_v24 = vld [vmem:[#allocation5 + $0xcc] ss:$24 sps:$4 sm:$0xff]   ;;  %v2804_v25 = vld [vmem:[#allocation5 + $0xfc] ss:$24 sps:$4 sm:$0xff]  }
  0x4b   :  { %307 = vmatprep.subr.bf16.mxu0 %v2799_v26  ;;  %2604 = vmatprep.subr.bf16.mxu1 %v3122_v4  ;;  %v2810_v26 = vld [vmem:[#allocation5 + $0x12c] ss:$24 sps:$4 sm:$0xff]  }
  0x4e   :  { %308 = vmatpush1.bf16.msra.mxu0 %v2801_v27  ;;  %2605 = vmatpush3.bf16.msra.mxu1 %v2802_v28  ;;  %v2816_v27 = vld [vmem:[#allocation5 + $0x15c] ss:$24 sps:$4 sm:$0xff]  }
  0x4f   :  { %309 = vmatprep.subr.bf16.mxu0 %v2805_v29  ;;  %2606 = vmatprep.subr.bf16.mxu1 %v3122_v4  ;;  %v3289_v29 = vld [vmem:[%s3546_s1] sm:$0xff] }
  0x52   :  { %310 = vmatpush1.bf16.msra.mxu0 %v2807_v31  ;;  %2607 = vmatpush3.bf16.msra.mxu1 %v2808_v32 }
  0x53   :  { %311 = vmatprep.subr.bf16.mxu0 %v2811_v33  ;;  %2608 = vmatprep.subr.bf16.mxu1 %v3122_v4 }
  0x56   :  { %312 = vmatpush1.bf16.msra.mxu0 %v2813_v34  ;;  %2609 = vmatpush3.bf16.msra.mxu1 %v2814_v35  ;;  %v3294_v34 = vld [vmem:[%s3546_s1 + $0x8] sm:$0xff] }
  0x57   :  { %2620 = vmatprep.subr.bf16.mxu1 %v3122_v4  ;;  %2614 = vmatprep.subr.bf16.mxu0 %v3122_v4 }
  0xc5   :  { %v74_v7 = vpop.xlane.xlu0 %73 }
  0xc6   :  { %v78_v8 = vmul.f32 0.0078125, %v74_v7 }
  0xc8   :  { %v3219_v9 = vsub.f32 %v69_v0, %v78_v8 }
  0xc9   :  { %v76_v10 = vpop.xlane.xlu0 %75 }
  0xca   :  { %v79_v11 = vmul.f32 0.0078125, %v76_v10  ;;  %v82_v12 = vmul.f32 %v3219_v9, %v3219_v9 }
  0xcc   :  { %v3223_v13 = vsub.f32 %v70_v1, %v79_v11  ;;  %84 = vadd.xlane.f32.xlu1 %v82_v12 }
  0xce   :  { %v83_v14 = vmul.f32 %v3223_v13, %v3223_v13 }
  0xd0   :  { %86 = vadd.xlane.f32.xlu1 %v83_v14 }
 0x159   :  { %v85_v36 = vpop.xlane.xlu1 %84 }
 0x15a   :  { %v88_v37 = vmul.f32 0.0078125, %v85_v36 }
 0x15c   :  { %v90_v38 = vadd.f32 1e-12, %v88_v37 }
 0x15d   :  { %v87_v39 = vpop.xlane.xlu1 %86 }
 0x15e   :  { %2953 = vrsqrt.f32 %v90_v38  ;;  %v89_v40 = vmul.f32 0.0078125, %v87_v39 }
 0x160   :  { %v91_v41 = vadd.f32 1e-12, %v89_v40 }
 0x162   :  { %2955 = vrsqrt.f32 %v91_v41 }
 0x168   :  { %v2954_v42 = vpop.eup %2953 }
 0x169   :  { %v94_v43 = vmul.f32 %v2954_v42, %v3219_v9 }
 0x16b   :  { %v96_v47 = vmul.f32 %v94_v43, %v71_v44 }
 0x16c   :  { %v2956_v45 = vpop.eup %2955 }
 0x16d   :  { %v95_v46 = vmul.f32 %v2956_v45, %v3223_v13  ;;  %v3240_v50 = vadd.f32 %v96_v47, %v72_v48 }
 0x16f   :  { %v97_v49 = vmul.f32 %v95_v46, %v71_v44 }
 0x171   :  { %v3242_v51 = vadd.f32 %v97_v49, %v72_v48 }
 0x173   :  { %v150_v52 = vpack.c.bf16 %v3242_v51, %v3240_v50 }
 0x175   :  { %330 = vmatmul.mubr.bf16.vlgmr.msra.gmra.mrb[0].mxu0 %v150_v52  ;;  %2611 = vmatmul.mubr.bf16.vlgmr.msra.gmra.mrb[0].mxu1 %v150_v52 }
 0x176   :  { %2616 = vmatprep.mubr.msk.bf16.mxu0 %vm3124_vm0, %v3122_v4  ;;  %2622 = vmatprep.mubr.msk.bf16.mxu1 %vm3124_vm0, %v3122_v4 }
 0x248   :  { %v331_v61 = vpop.f32.mrb[0].mxu0  ;;  %v374_v62 = vpop.f32.mrb[0].mxu1 }
 0x249   :  { %v333_v0 = vpop.f32.mrb[1].mxu0  ;;  %v2612_v1 = vpop.f32.mrb[1].mxu1  ;;  %v332_v5 = vadd.f32 %v331_v61, %v157_v59  ;;  %v375_v6 = vadd.f32 %v374_v62, %v165_v60 }
 0x24a   :  { %v335_v2 = vpop.f32.mrb[2].mxu0  ;;  %v377_v3 = vpop.f32.mrb[2].mxu1  ;;  %v334_v11 = vadd.f32 %v333_v0, %v161_v63 }
 0x24b   :  { %v336_v7 = vadd.f32 %v335_v2, %v157_v59  ;;  %v378_v8 = vadd.f32 %v377_v3, %v165_v60  ;;  %v337_v9 = vpop.f32.mrb[3].mxu0  ;;  %v2613_v10 = vpop.f32.mrb[3].mxu1 }
 0x24c   :  { %v338_v12 = vadd.f32 %v337_v9, %v161_v63 }
 0x24d   :  { %v3263_v13 = vpack.c.bf16 %v378_v8, %v375_v6  ;;  %v381_v14 = vpack.c.bf16 %v336_v7, %v332_v5 }
 0x24e   :  { %v382_v15 = vpack.c.bf16 %v338_v12, %v334_v11 }
 0x24f   :  { %2621 = vmatpush3.bf16.msra.mxu1 %v3263_v13  ;;  %505 = vrot.lane.b32.xlu1 %v381_v14, %s3120_s3 }
 0x250   :  { %508 = vrot.lane.b32.xlu0 %v382_v15, %s3120_s3  ;;  %v389_v16 = vsel %vm384_vm1, %v382_v15, 0  ;;  %2632 = vmatprep.subr.bf16.mxu1 %v3122_v4 }
 0x251   :  { %2615 = vmatpush3.bf16.xpose.msra.mxu0 %v389_v16 }
 0x252   :  { %2626 = vmatprep.subr.bf16.mxu0 %v3122_v4 }
 0x258   :  { %2617 = vmatmul.mubr.msk.bf16.vlgmr.msra.gmra.mrb[4].mxu0 %vm384_vm1, %v381_v14 }
 0x259   :  { %2628 = vmatprep.mubr.msk.bf16.mxu0 %vm3124_vm0, %v3122_v4 }
 0x2c1   :  { %v506_v20 = vpop.permute.xlu1 %505 }
 0x2c2   :  { %v509_v17 = vpop.permute.xlu0 %508 }
 0x2c3   :  { %v514_v18 = vsel %vm384_vm1, %v509_v17, 0 }
 0x2c4   :  { %2627 = vmatpush3.bf16.xpose.msra.mxu0 %v514_v18 }
 0x2c5   :  { %2638 = vmatprep.subr.bf16.mxu0 %v3122_v4 }
 0x2cb   :  { %2629 = vmatmul.mubr.msk.bf16.vlgmr.msra.gmra.mrb[8].mxu0 %vm384_vm1, %v506_v20 }
 0x2cc   :  { %2639 = vmatpush3.bf16.msra.mxu0 %v2774_v19  ;;  %2654 = vmatprep.mubr.msk.bf16.mxu0 %vm3124_vm0, %v3122_v4 }
 0x2cd   :  { %2640 = vmatprep.subr.bf16.mxu0 %v3122_v4 }
 0x2d0   :  { %2641 = vmatpush3.bf16.msra.mxu0 %v2780_v21 }
 0x2d1   :  { %2642 = vmatprep.subr.bf16.mxu0 %v3122_v4 }
 0x2d4   :  { %2643 = vmatpush3.bf16.msra.mxu0 %v2786_v22 }
 0x2d5   :  { %2644 = vmatprep.subr.bf16.mxu0 %v3122_v4 }
 0x2d8   :  { %2645 = vmatpush3.bf16.msra.mxu0 %v2792_v23 }
 0x2d9   :  { %2646 = vmatprep.subr.bf16.mxu0 %v3122_v4 }
 0x2dc   :  { %2647 = vmatpush3.bf16.msra.mxu0 %v2798_v24 }
 0x2dd   :  { %2648 = vmatprep.subr.bf16.mxu0 %v3122_v4 }
 0x2e0   :  { %2649 = vmatpush3.bf16.msra.mxu0 %v2804_v25 }
 0x2e1   :  { %2650 = vmatprep.subr.bf16.mxu0 %v3122_v4 }
 0x2e4   :  { %2651 = vmatpush3.bf16.msra.mxu0 %v2810_v26 }
 0x2e5   :  { %2652 = vmatprep.subr.bf16.mxu0 %v3122_v4 }
 0x2e8   :  { %2653 = vmatpush3.bf16.msra.mxu0 %v2816_v27 }
 0x32b   :  { %v425_v28 = vpop.f32.mrb[4].mxu0 }
 0x32c   :  { %v432_v31 = vmul.f32 0.125, %v425_v28  ;;  %v2618_v32 = vpop.f32.mrb[5].mxu0 }
 0x32d   :  { %v428_v33 = vpop.f32.mrb[6].mxu0 }
 0x32e   :  { %v433_v35 = vmul.f32 0.125, %v428_v33  ;;  %v2619_v36 = vpop.f32.mrb[7].mxu0  ;;  %v434_v37 = vadd.f32 %v432_v31, %v3289_v29 }
 0x330   :  { %v437_v38 = vsel %vm436_vm2, %v434_v37, -inf  ;;  %v435_v39 = vadd.f32 %v433_v35, %v3294_v34 }
 0x331   :  { %438 = vmax.xlane.f32.xlu1 %v437_v38 }
 0x332   :  { %v440_v40 = vsel %vm436_vm2, %v435_v39, -inf }
 0x333   :  { %441 = vmax.xlane.f32.xlu0 %v440_v40 }
 0x39e   :  { %v550_v41 = vpop.f32.mrb[8].mxu0 }
 0x39f   :  { %v557_v42 = vmul.f32 0.125, %v550_v41  ;;  %v2630_v43 = vpop.f32.mrb[9].mxu0 }
 0x3a0   :  { %v553_v44 = vpop.f32.mrb[10].mxu0 }
 0x3a1   :  { %v558_v45 = vmul.f32 0.125, %v553_v44  ;;  %v2631_v46 = vpop.f32.mrb[11].mxu0  ;;  %v559_v47 = vadd.f32 %v557_v42, %v3289_v29 }
 0x3a3   :  { %v561_v48 = vsel %vm436_vm2, %v559_v47, -inf  ;;  %v560_v49 = vadd.f32 %v558_v45, %v3294_v34 }
 0x3a4   :  { %562 = vmax.xlane.f32.xlu0 %v561_v48 }
 0x3a5   :  { %v564_v52 = vsel %vm436_vm2, %v560_v49, -inf }
 0x3a6   :  { %565 = vmax.xlane.f32.xlu1 %v564_v52 }
 0x3be   :  { %v439_v53 = vpop.xlane.xlu1 %438 }
 0x3bf   :  { %v443_v57 = vsub.f32 %v434_v37, %v439_v53 }
 0x3c0   :  { %v442_v59 = vpop.xlane.xlu0 %441 }
 0x3c1   :  { %v445_v60 = vmul.f32 1.442695, %v443_v57  ;;  %v444_v61 = vsub.f32 %v435_v39, %v442_v59 }
 0x3c3   :  { %2957 = vpow2.f32 %v445_v60  ;;  %v447_v62 = vmul.f32 1.442695, %v444_v61 }
 0x3c5   :  { %2959 = vpow2.f32 %v447_v62  ;;  %v2817_v62 = vld [vmem:[#allocation5 + $0x10] ss:$24 sps:$4 sm:$0xff]  }
 0x3cd   :  { %v2958_v63 = vpop.eup %2957 }
 0x3ce   :  { %v449_v0 = vsel %vm436_vm2, %v2958_v63, 0.0 }
 0x3cf   :  { %v2960_v1 = vpop.eup %2959  ;;  %450 = vadd.xlane.f32.xlu0 %v449_v0  ;;  %v2822_v0 = vld [vmem:[#allocation5 + $0x44] ss:$24 sps:$4 sm:$0xff]  }
 0x3d0   :  { %v452_v2 = vsel %vm436_vm2, %v2960_v1, 0.0 }
 0x3d1   :  { %453 = vadd.xlane.f32.xlu1 %v452_v2 }
 0x431   :  { %v563_v3 = vpop.xlane.xlu0 %562 }
 0x432   :  { %v567_v5 = vsub.f32 %v559_v47, %v563_v3  ;;  %v643_v47 = vld [vmem:[#allocation2 + $0x4] ss:$0 sm:$0xff] }
 0x433   :  { %v566_v6 = vpop.xlane.xlu1 %565 }
 0x434   :  { %v569_v7 = vmul.f32 1.442695, %v567_v5  ;;  %v568_v8 = vsub.f32 %v560_v49, %v566_v6 }
 0x436   :  { %2961 = vpow2.f32 %v569_v7  ;;  %v571_v9 = vmul.f32 1.442695, %v568_v8 }
 0x438   :  { %2963 = vpow2.f32 %v571_v9 }
 0x440   :  { %v2962_v10 = vpop.eup %2961 }
 0x441   :  { %v573_v11 = vsel %vm436_vm2, %v2962_v10, 0.0 }
 0x442   :  { %v2964_v12 = vpop.eup %2963  ;;  %574 = vadd.xlane.f32.xlu0 %v573_v11  ;;  %v2828_v11 = vld [vmem:[#allocation5 + $0xa4] ss:$24 sps:$4 sm:$0xff]  }
 0x443   :  { %v576_v14 = vsel %vm436_vm2, %v2964_v12, 0.0 }
 0x444   :  { %577 = vadd.xlane.f32.xlu1 %v576_v14  ;;  %v2831_v14 = vld [vmem:[#allocation5 + $0xd4] ss:$24 sps:$4 sm:$0xff]  }
 0x458   :  { %585 = vrot.lane.b32.xlu0 %v3263_v13, %s3120_s3 }
 0x45c   :  { %v451_v15 = vpop.xlane.xlu0 %450 }
 0x45d   :  { %2965 = vrcp.f32 %v451_v15  ;;  %v2829_v15 = vld [vmem:[#allocation5 + $0xd0] ss:$24 sps:$4 sm:$0xff]  }
 0x45e   :  { %v454_v16 = vpop.xlane.xlu1 %453 }
 0x45f   :  { %2967 = vrcp.f32 %v454_v16  ;;  %v2834_v16 = vld [vmem:[#allocation5 + $0x104] ss:$24 sps:$4 sm:$0xff]  }
 0x467   :  { %v2966_v17 = vpop.eup %2965 }
 0x468   :  { %v457_v19 = vmul.f32 %v2966_v17, %v2958_v63  ;;  %v2819_v63 = vld [vmem:[#allocation5 + $0x14] ss:$24 sps:$4 sm:$0xff]   ;;  %v2832_v17 = vld [vmem:[#allocation5 + $0x100] ss:$24 sps:$4 sm:$0xff]  }
 0x469   :  { %v2968_v18 = vpop.eup %2967 }
 0x46a   :  { %v458_v20 = vmul.f32 %v2968_v18, %v2960_v1  ;;  %v2820_v1 = vld [vmem:[#allocation5 + $0x40] ss:$24 sps:$4 sm:$0xff]   ;;  %v2837_v18 = vld [vmem:[#allocation5 + $0x134] ss:$24 sps:$4 sm:$0xff]  }
 0x46c   :  { %v459_v21 = vpack.c.bf16 %v458_v20, %v457_v19  ;;  %v2835_v19 = vld [vmem:[#allocation5 + $0x130] ss:$24 sps:$4 sm:$0xff]   ;;  %v2840_v20 = vld [vmem:[#allocation5 + $0x164] ss:$24 sps:$4 sm:$0xff]  }
 0x46e   :  { %2623 = vmatmul.mubr.msk.bf16.vlgmr.msra.gmra.mrb[4].mxu1 %vm436_vm2, %v459_v21  ;;  %v2838_v21 = vld [vmem:[#allocation5 + $0x160] ss:$24 sps:$4 sm:$0xff]  }
 0x46f   :  { %2634 = vmatprep.mubr.msk.bf16.mxu1 %vm3124_vm0, %v3122_v4 }
 0x4cf   :  { %v575_v22 = vpop.xlane.xlu0 %574 }
 0x4d0   :  { %2969 = vrcp.f32 %v575_v22 }
 0x4d1   :  { %v578_v23 = vpop.xlane.xlu1 %577 }
 0x4d2   :  { %2971 = vrcp.f32 %v578_v23 }
 0x4d3   :  { %v586_v24 = vpop.permute.xlu0 %585 }
 0x4d4   :  { %2633 = vmatpush3.bf16.msra.mxu1 %v586_v24 }
 0x4d5   :  { %841 = vmatprep.subr.bf16.mxu1 %v2819_v63  ;;  %v749_v63 = vld [vmem:[#allocation2 + $0x7] ss:$8 sm:$0x3] }
 0x4da   :  { %v2970_v13 = vpop.eup %2969 }
 0x4db   :  { %v581_v26 = vmul.f32 %v2970_v13, %v2962_v10  ;;  %v2823_v10 = vld [vmem:[#allocation5 + $0x70] ss:$24 sps:$4 sm:$0xff]  }
 0x4dc   :  { %v2972_v25 = vpop.eup %2971 }
 0x4dd   :  { %v582_v27 = vmul.f32 %v2972_v25, %v2964_v12  ;;  %v2826_v12 = vld [vmem:[#allocation5 + $0xa0] ss:$24 sps:$4 sm:$0xff]  }
 0x4df   :  { %v583_v28 = vpack.c.bf16 %v582_v27, %v581_v26 }
 0x4e1   :  { %2635 = vmatmul.mubr.msk.bf16.vlgmr.msra.gmra.mrb[8].mxu1 %vm436_vm2, %v583_v28  ;;  %v719_v28 = vld [vmem:[#allocation2 + $0x5] ss:$0 sm:$0xff] }
 0x4e2   :  { %873 = vmatprep.mubr.bf16.mxu1 %v3123_v30  ;;  %842 = vmatpush1.bf16.msra.mxu1 %v2817_v62  ;;  %v2856_v62 = vld [vmem:[%s3550_s5 + $0x38] sm:$0xff]  }
 0x4e3   :  { %843 = vmatprep.subr.bf16.mxu1 %v2822_v0  ;;  %v754_v0 = vrot.slane %v749_v63, %v3253_v55 }
 0x4e6   :  { %844 = vmatpush1.bf16.msra.mxu1 %v2820_v1  ;;  %v758_v1 = vrot.slane %v749_v63, %v3257_v58 }
 0x541   :  { %v497_v31 = vpop.f32.mrb[4].mxu1 }
 0x542   :  { %v2624_v32 = vpop.f32.mrb[5].mxu1 }
 0x543   :  { %v500_v33 = vpop.f32.mrb[6].mxu1 }
 0x544   :  { %v2625_v35 = vpop.f32.mrb[7].mxu1 }
 0x5b4   :  { %v625_v36 = vpop.f32.mrb[8].mxu1 }
 0x5b5   :  { %v2636_v37 = vpop.f32.mrb[9].mxu1 }
 0x5b6   :  { %v628_v38 = vpop.f32.mrb[10].mxu1 }
 0x5b7   :  { %v2759_v39 = vpack.i.bf16 %v628_v38, %v625_v36  ;;  %v2637_v40 = vpop.f32.mrb[11].mxu1  ;;  %v720_v36 = vld [vmem:[#allocation2 + $0x6] ss:$0 sm:$0xff] }
 0x5b9   :  { %2760 = vrot.lane.b32.xlu1 %v2759_v39, %s3120_s3 }
 0x62b   :  { %v2761_v41 = vpop.permute.xlu1 %2760 }
 0x62c   :  { %v2763_v42 = vunpack.i.h.bf16 %v2761_v41  ;;  %v2762_v43 = vunpack.i.l.bf16 %v2761_v41  ;;  %v2841_v41 = vld [vmem:[%s3550_s5 + $0x40] sm:$0xff]  }
 0x62d   :  { %2513 = vmatprep.subr.bf16.mxu0 %v2841_v41 }
 0x62e   :  { %v641_v44 = vsel %vm384_vm1, %v500_v33, %v2763_v42  ;;  %v640_v45 = vsel %vm384_vm1, %v497_v31, %v2762_v43  ;;  %v2842_v42 = vld [vmem:[%s3550_s5] sm:$0xff]   ;;  %v2843_v43 = vld [vmem:[%s3550_s5 + $0x48] sm:$0xff]  }
 0x62f   :  { %v642_v46 = vpack.c.bf16 %v641_v44, %v640_v45  ;;  %v2844_v44 = vld [vmem:[%s3550_s5 + $0x8] sm:$0xff]   ;;  %v2845_v45 = vld [vmem:[%s3550_s5 + $0x50] sm:$0xff]  }
 0x631   :  { %2655 = vmatmul.mubr.bf16.vlgmr.msra.gmra.mrb[12].mxu0 %v642_v46  ;;  %v2846_v46 = vld [vmem:[%s3550_s5 + $0x10] sm:$0xff]  }
 0x632   :  { %2514 = vmatpush3.bf16.msra.mxu0 %v2842_v42 }
 0x633   :  { %2515 = vmatprep.subr.bf16.mxu0 %v2843_v43 }
 0x636   :  { %2516 = vmatpush3.bf16.msra.mxu0 %v2844_v44 }
 0x637   :  { %2517 = vmatprep.subr.bf16.mxu0 %v2845_v45 }
 0x63a   :  { %2518 = vmatpush3.bf16.msra.mxu0 %v2846_v46 }
 0x704   :  { %v710_v48 = vpop.f32.mrb[12].mxu0 }
 0x705   :  { %v711_v49 = vadd.f32 %v710_v48, %v643_v47  ;;  %v2656_v52 = vpop.f32.mrb[13].mxu0  ;;  %v2848_v48 = vld [vmem:[%s3550_s5 + $0x18] sm:$0xff]  }
 0x706   :  { %v713_v53 = vpop.f32.mrb[14].mxu0  ;;  %v2850_v52 = vld [vmem:[%s3550_s5 + $0x20] sm:$0xff]  }
 0x707   :  { %v714_v57 = vadd.f32 %v713_v53, %v643_v47  ;;  %v2657_v59 = vpop.f32.mrb[15].mxu0  ;;  %v717_v60 = vadd.f32 %v711_v49, %v3240_v50  ;;  %v2847_v47 = vld [vmem:[%s3550_s5 + $0x58] sm:$0xff]   ;;  %v2849_v49 = vld [vmem:[%s3550_s5 + $0x60] sm:$0xff]   ;;  %v2851_v53 = vld [vmem:[%s3550_s5 + $0x68] sm:$0xff]  }
 0x708   :  { %2519 = vmatprep.subr.bf16.mxu0 %v2847_v47  ;;  %v2853_v59 = vld [vmem:[%s3550_s5 + $0x70] sm:$0xff]  }
 0x709   :  { %721 = vadd.xlane.f32.xlu1 %v717_v60  ;;  %v718_v61 = vadd.f32 %v714_v57, %v3242_v51  ;;  %v2825_v51 = vld [vmem:[#allocation5 + $0x74] ss:$24 sps:$4 sm:$0xff]   ;;  %2520 = vmatpush3.bf16.msra.mxu0 %v2848_v48  ;;  %v2852_v57 = vld [vmem:[%s3550_s5 + $0x28] sm:$0xff]  }
 0x70a   :  { %845 = vmatprep.subr.bf16.mxu1 %v2825_v51  ;;  %2521 = vmatprep.subr.bf16.mxu0 %v2849_v49 }
 0x70b   :  { %723 = vadd.xlane.f32.xlu0 %v718_v61  ;;  %846 = vmatpush1.bf16.msra.mxu1 %v2823_v10 }
 0x70c   :  { %847 = vmatprep.subr.bf16.mxu1 %v2828_v11 }
 0x70d   :  { %2522 = vmatpush3.bf16.msra.mxu0 %v2850_v52 }
 0x70e   :  { %2523 = vmatprep.subr.bf16.mxu0 %v2851_v53 }
 0x70f   :  { %848 = vmatpush1.bf16.msra.mxu1 %v2826_v12 }
 0x710   :  { %849 = vmatprep.subr.bf16.mxu1 %v2831_v14 }
 0x711   :  { %2524 = vmatpush3.bf16.msra.mxu0 %v2852_v57 }
 0x712   :  { %2525 = vmatprep.subr.bf16.mxu0 %v2853_v59  ;;  %v954_v59 = vld [vmem:[#allocation2 + $0x18] ss:$0 sm:$0xff] }
 0x713   :  { %850 = vmatpush1.bf16.msra.mxu1 %v2829_v15 }
 0x714   :  { %851 = vmatprep.subr.bf16.mxu1 %v2834_v16 }
 0x717   :  { %852 = vmatpush1.bf16.msra.mxu1 %v2832_v17 }
 0x718   :  { %853 = vmatprep.subr.bf16.mxu1 %v2837_v18 }
 0x71b   :  { %854 = vmatpush1.bf16.msra.mxu1 %v2835_v19 }
 0x71c   :  { %855 = vmatprep.subr.bf16.mxu1 %v2840_v20 }
 0x71f   :  { %856 = vmatpush1.bf16.msra.mxu1 %v2838_v21 }
 0x796   :  { %v722_v2 = vpop.xlane.xlu1 %721 }
 0x797   :  { %v725_v3 = vmul.f32 0.0078125, %v722_v2 }
 0x798   :  { %v724_v5 = vpop.xlane.xlu0 %723 }
 0x799   :  { %v727_v6 = vsub.f32 %v717_v60, %v725_v3  ;;  %v726_v7 = vmul.f32 0.0078125, %v724_v5  ;;  %v2854_v60 = vld [vmem:[%s3550_s5 + $0x30] sm:$0xff]  }
 0x79a   :  { %2526 = vmatpush3.bf16.msra.mxu0 %v2854_v60 }
 0x79b   :  { %v728_v8 = vsub.f32 %v718_v61, %v726_v7  ;;  %v729_v9 = vmul.f32 %v727_v6, %v727_v6  ;;  %v2855_v61 = vld [vmem:[%s3550_s5 + $0x78] sm:$0xff]  }
 0x79c   :  { %2527 = vmatprep.subr.bf16.mxu0 %v2855_v61 }
 0x79d   :  { %731 = vadd.xlane.f32.xlu0 %v729_v9  ;;  %v730_v50 = vmul.f32 %v728_v8, %v728_v8 }
 0x79e   :  { %2528 = vmatpush3.bf16.msra.mxu0 %v2856_v62 }
 0x79f   :  { %733 = vadd.xlane.f32.xlu1 %v730_v50  ;;  %2658 = vmatprep.subr.bf16.mxu0 %v3122_v4 }
 0x82a   :  { %v732_v22 = vpop.xlane.xlu0 %731 }
 0x82b   :  { %v735_v23 = vmul.f32 0.0078125, %v732_v22 }
 0x82c   :  { %v734_v24 = vpop.xlane.xlu1 %733 }
 0x82d   :  { %v737_v13 = vadd.f32 1e-12, %v735_v23  ;;  %v736_v25 = vmul.f32 0.0078125, %v734_v24 }
 0x82f   :  { %2973 = vrsqrt.f32 %v737_v13  ;;  %v738_v26 = vadd.f32 1e-12, %v736_v25 }
 0x831   :  { %2975 = vrsqrt.f32 %v738_v26 }
 0x839   :  { %v2974_v27 = vpop.eup %2973 }
 0x83a   :  { %v741_v31 = vmul.f32 %v2974_v27, %v727_v6 }
 0x83b   :  { %v2976_v32 = vpop.eup %2975 }
 0x83c   :  { %v742_v33 = vmul.f32 %v2976_v32, %v728_v8  ;;  %v743_v35 = vmul.f32 %v741_v31, %v719_v28 }
 0x83e   :  { %v744_v37 = vmul.f32 %v742_v33, %v719_v28  ;;  %v3320_v38 = vadd.f32 %v743_v35, %v720_v36 }
 0x840   :  { %v3322_v39 = vadd.f32 %v744_v37, %v720_v36 }
 0x842   :  { %v747_v40 = vpack.c.bf16 %v3322_v39, %v3320_v38 }
 0x844   :  { %874 = vmatmul.mubr.bf16.vlgmr.msra.gmra.mrb[12].mxu1 %v747_v40 }
 0x845   :  { %1350 = vmatprep.mubr.bf16.mxu1 %v3123_v30 }
 0x917   :  { %v875_v2 = vpop.f32.mrb[12].mxu1 }
 0x918   :  { %v876_v3 = vadd.f32 %v875_v2, %v754_v0  ;;  %v877_v5 = vpop.f32.mrb[13].mxu1 }
 0x919   :  { %v878_v6 = vadd.f32 %v877_v5, %v758_v1  ;;  %v879_v7 = vpop.f32.mrb[14].mxu1 }
 0x91a   :  { %v884_v8 = vmul.f32 %v876_v3, %v876_v3  ;;  %v880_v9 = vadd.f32 %v879_v7, %v754_v0  ;;  %v881_v50 = vpop.f32.mrb[15].mxu1  ;;  %v2859_v7 = vld [vmem:[#allocation5 + $0x184] ss:$24 sps:$4 sm:$0xff]  }
 0x91b   :  { %v885_v51 = vmul.f32 %v878_v6, %v878_v6  ;;  %v882_v10 = vadd.f32 %v881_v50, %v758_v1  ;;  %1318 = vmatprep.subr.bf16.mxu1 %v2859_v7  ;;  %v2865_v50 = vld [vmem:[#allocation5 + $0x1b8] ss:$24 sps:$4 sm:$0xff]  }
 0x91c   :  { %v888_v11 = vmul.f32 %v884_v8, %v876_v3  ;;  %v886_v12 = vmul.f32 %v880_v9, %v880_v9  ;;  %v2860_v8 = vld [vmem:[#allocation5 + $0x188] ss:$24 sps:$4 sm:$0xff]  }
 0x91d   :  { %v889_v14 = vmul.f32 %v885_v51, %v878_v6  ;;  %v887_v15 = vmul.f32 %v882_v10, %v882_v10  ;;  %v2862_v51 = vld [vmem:[#allocation5 + $0x1b0] ss:$24 sps:$4 sm:$0xff]  }
 0x91e   :  { %v892_v16 = vmul.f32 0.044715, %v888_v11  ;;  %v890_v17 = vmul.f32 %v886_v12, %v880_v9 }
 0x91f   :  { %v893_v18 = vmul.f32 0.044715, %v889_v14  ;;  %v891_v19 = vmul.f32 %v887_v15, %v882_v10 }
 0x920   :  { %v896_v20 = vadd.f32 %v892_v16, %v876_v3  ;;  %v894_v21 = vmul.f32 0.044715, %v890_v17  ;;  %v2869_v17 = vld [vmem:[#allocation5 + $0x1e4] ss:$24 sps:$4 sm:$0xff]  }
 0x921   :  { %v897_v22 = vadd.f32 %v893_v18, %v878_v6  ;;  %v895_v23 = vmul.f32 0.044715, %v891_v19  ;;  %v2867_v18 = vld [vmem:[#allocation5 + $0x1e0] ss:$24 sps:$4 sm:$0xff]  }
 0x922   :  { %v900_v24 = vmul.f32 0.7978846, %v896_v20  ;;  %v898_v13 = vadd.f32 %v894_v21, %v880_v9  ;;  %v2870_v19 = vld [vmem:[#allocation5 + $0x1e8] ss:$24 sps:$4 sm:$0xff]   ;;  %v2874_v20 = vld [vmem:[#allocation5 + $0x214] ss:$24 sps:$4 sm:$0xff]  }
 0x923   :  { %v901_v25 = vmul.f32 0.7978846, %v897_v22  ;;  %v899_v26 = vadd.f32 %v895_v23, %v882_v10  ;;  %v2872_v21 = vld [vmem:[#allocation5 + $0x210] ss:$24 sps:$4 sm:$0xff]   ;;  %v2879_v23 = vld [vmem:[#allocation5 + $0x244] ss:$24 sps:$4 sm:$0xff]  }
 0x924   :  { %2977 = vtanh.f32 %v900_v24  ;;  %v902_v27 = vmul.f32 0.7978846, %v898_v13  ;;  %v2875_v22 = vld [vmem:[#allocation5 + $0x218] ss:$24 sps:$4 sm:$0xff]   ;;  %v2880_v13 = vld [vmem:[#allocation5 + $0x248] ss:$24 sps:$4 sm:$0xff]  }
 0x925   :  { %2979 = vtanh.f32 %v901_v25  ;;  %v903_v28 = vmul.f32 0.7978846, %v899_v26  ;;  %v2877_v24 = vld [vmem:[#allocation5 + $0x240] ss:$24 sps:$4 sm:$0xff]   ;;  %v2884_v25 = vld [vmem:[#allocation5 + $0x274] ss:$24 sps:$4 sm:$0xff]  }
 0x926   :  { %2981 = vtanh.f32 %v902_v27  ;;  %v2882_v26 = vld [vmem:[#allocation5 + $0x270] ss:$24 sps:$4 sm:$0xff]  }
 0x927   :  { %2983 = vtanh.f32 %v903_v28  ;;  %v2885_v27 = vld [vmem:[#allocation5 + $0x278] ss:$24 sps:$4 sm:$0xff]   ;;  %v2889_v28 = vld [vmem:[#allocation5 + $0x2a4] ss:$24 sps:$4 sm:$0xff]  }
 0x92e   :  { %v2978_v31 = vpop.eup %2977 }
 0x92f   :  { %v2980_v32 = vpop.eup %2979  ;;  %v908_v33 = vadd.f32 1.0, %v2978_v31  ;;  %v2887_v31 = vld [vmem:[#allocation5 + $0x2a0] ss:$24 sps:$4 sm:$0xff]  }
 0x930   :  { %v2982_v35 = vpop.eup %2981  ;;  %v909_v36 = vadd.f32 1.0, %v2980_v32  ;;  %v2890_v32 = vld [vmem:[#allocation5 + $0x2a8] ss:$24 sps:$4 sm:$0xff]  }
 0x931   :  { %v2984_v37 = vpop.eup %2983  ;;  %v912_v40 = vmul.f32 0.5, %v908_v33  ;;  %v910_v41 = vadd.f32 1.0, %v2982_v35  ;;  %v2894_v33 = vld [vmem:[#allocation5 + $0x2d4] ss:$24 sps:$4 sm:$0xff]   ;;  %v2892_v35 = vld [vmem:[#allocation5 + $0x2d0] ss:$24 sps:$4 sm:$0xff]  }
 0x932   :  { %v911_v42 = vadd.f32 1.0, %v2984_v37  ;;  %v913_v43 = vmul.f32 0.5, %v909_v36  ;;  %v2895_v36 = vld [vmem:[#allocation5 + $0x2d8] ss:$24 sps:$4 sm:$0xff]  }
 0x933   :  { %v914_v44 = vmul.f32 0.5, %v910_v41  ;;  %v916_v46 = vmul.f32 %v912_v40, %v876_v3 }
 0x934   :  { %v915_v45 = vmul.f32 0.5, %v911_v42  ;;  %v917_v48 = vmul.f32 %v913_v43, %v878_v6  ;;  %v2857_v6 = vld [vmem:[#allocation5 + $0x180] ss:$24 sps:$4 sm:$0xff]  }
 0x935   :  { %v918_v47 = vmul.f32 %v914_v44, %v880_v9  ;;  %v2864_v9 = vld [vmem:[#allocation5 + $0x1b4] ss:$24 sps:$4 sm:$0xff]   ;;  %1319 = vmatpush1.bf16.msra.mxu1 %v2857_v6 }
 0x936   :  { %v919_v49 = vmul.f32 %v915_v45, %v882_v10  ;;  %1320 = vmatprep.subr.bf16.mxu1 %v2864_v9 }
 0x937   :  { %v952_v52 = vpack.c.bf16 %v918_v47, %v916_v46  ;;  %v1094_v46 = vld [vmem:[#allocation2 + $0x19] ss:$0 sm:$0xff] }
 0x938   :  { %v953_v53 = vpack.c.bf16 %v919_v49, %v917_v48 }
 0x939   :  { %1321 = vmatpush1.bf16.msra.mxu1 %v2862_v51 }
 0x93a   :  { %1083 = vmatprep.mubr.bf16.mxu0 %v953_v53  ;;  %1322 = vmatprep.subr.bf16.mxu1 %v2869_v17  ;;  %v1095_v53 = vld [vmem:[#allocation2 + $0x1a] ss:$0 sm:$0xff] }
 0x93b   :  { %1084 = vmatmul.mubr.bf16.vlgmr.msra.gmra.mrb[16].mxu0 %v952_v52 }
 0x93c   :  { %2674 = vmatprep.mubr.msk.bf16.mxu0 %vm3124_vm0, %v3122_v4  ;;  %2659 = vmatpush3.bf16.msra.mxu0 %v2860_v8 }
 0x93d   :  { %2660 = vmatprep.subr.bf16.mxu0 %v3122_v4  ;;  %1323 = vmatpush1.bf16.msra.mxu1 %v2867_v18 }
 0x93e   :  { %1324 = vmatprep.subr.bf16.mxu1 %v2874_v20 }
 0x940   :  { %2661 = vmatpush3.bf16.msra.mxu0 %v2865_v50 }
 0x941   :  { %2662 = vmatprep.subr.bf16.mxu0 %v3122_v4  ;;  %1325 = vmatpush1.bf16.msra.mxu1 %v2872_v21 }
 0x942   :  { %1326 = vmatprep.subr.bf16.mxu1 %v2879_v23 }
 0x944   :  { %2663 = vmatpush3.bf16.msra.mxu0 %v2870_v19 }
 0x945   :  { %2664 = vmatprep.subr.bf16.mxu0 %v3122_v4  ;;  %1327 = vmatpush1.bf16.msra.mxu1 %v2877_v24 }
 0x946   :  { %1328 = vmatprep.subr.bf16.mxu1 %v2884_v25 }
 0x948   :  { %2665 = vmatpush3.bf16.msra.mxu0 %v2875_v22 }
 0x949   :  { %2666 = vmatprep.subr.bf16.mxu0 %v3122_v4  ;;  %1329 = vmatpush1.bf16.msra.mxu1 %v2882_v26 }
 0x94a   :  { %1330 = vmatprep.subr.bf16.mxu1 %v2889_v28 }
 0x94c   :  { %2667 = vmatpush3.bf16.msra.mxu0 %v2880_v13 }
 0x94d   :  { %2668 = vmatprep.subr.bf16.mxu0 %v3122_v4  ;;  %1331 = vmatpush1.bf16.msra.mxu1 %v2887_v31 }
 0x94e   :  { %1332 = vmatprep.subr.bf16.mxu1 %v2894_v33 }
 0x950   :  { %2669 = vmatpush3.bf16.msra.mxu0 %v2885_v27 }
 0x951   :  { %2670 = vmatprep.subr.bf16.mxu0 %v3122_v4  ;;  %1333 = vmatpush1.bf16.msra.mxu1 %v2892_v35 }
 0x952   :  { %2678 = vmatprep.subr.bf16.mxu1 %v3122_v4 }
 0x954   :  { %2671 = vmatpush3.bf16.msra.mxu0 %v2890_v32 }
 0x955   :  { %2672 = vmatprep.subr.bf16.mxu0 %v3122_v4 }
 0x958   :  { %2673 = vmatpush3.bf16.msra.mxu0 %v2895_v36 }
 0x959   :  { %2702 = vmatprep.subr.bf16.mxu0 %v3122_v4 }
 0xa0e   :  { %v2529_v57 = vpop.f32.mrb[16].mxu0 }
 0xa0f   :  { %v2530_v60 = vpop.f32.mrb[17].mxu0 }
 0xa10   :  { %v2531_v61 = vadd.f32 %v2530_v60, %v2529_v57  ;;  %v2532_v62 = vpop.f32.mrb[18].mxu0 }
 0xa11   :  { %v2533_v63 = vpop.f32.mrb[19].mxu0 }
 0xa12   :  { %v1086_v0 = vadd.f32 %v2531_v61, %v954_v59  ;;  %v2534_v1 = vadd.f32 %v2533_v63, %v2532_v62  ;;  %v1173_v62 = vld [vmem:[#allocation2 + $0x1b] ss:$8 sm:$0x7] }
 0xa13   :  { %v1178_v63 = vrot.slane %v1173_v62, %v3253_v55 }
 0xa14   :  { %v1089_v2 = vadd.f32 %v2534_v1, %v954_v59  ;;  %v1092_v3 = vadd.f32 %v1086_v0, %v3320_v38  ;;  %v1186_v0 = vrot.slane %v1173_v62, %v164_v56 }
 0xa16   :  { %1096 = vadd.xlane.f32.xlu0 %v1092_v3  ;;  %v1093_v5 = vadd.f32 %v1089_v2, %v3322_v39 }
 0xa18   :  { %1098 = vadd.xlane.f32.xlu1 %v1093_v5 }
 0xaa3   :  { %v1097_v38 = vpop.xlane.xlu0 %1096 }
 0xaa4   :  { %v1100_v10 = vmul.f32 0.0078125, %v1097_v38 }
 0xaa5   :  { %v1099_v39 = vpop.xlane.xlu1 %1098 }
 0xaa6   :  { %v1102_v11 = vsub.f32 %v1092_v3, %v1100_v10  ;;  %v1101_v12 = vmul.f32 0.0078125, %v1099_v39  ;;  %v1182_v3 = vrot.slane %v1173_v62, %v3257_v58 }
 0xaa8   :  { %v1103_v14 = vsub.f32 %v1093_v5, %v1101_v12  ;;  %v1104_v15 = vmul.f32 %v1102_v11, %v1102_v11 }
 0xaaa   :  { %1106 = vadd.xlane.f32.xlu0 %v1104_v15  ;;  %v1105_v16 = vmul.f32 %v1103_v14, %v1103_v14 }
 0xaac   :  { %1108 = vadd.xlane.f32.xlu1 %v1105_v16 }
 0xb37   :  { %v1107_v37 = vpop.xlane.xlu0 %1106 }
 0xb38   :  { %v1110_v40 = vmul.f32 0.0078125, %v1107_v37 }
 0xb39   :  { %v1109_v41 = vpop.xlane.xlu1 %1108 }
 0xb3a   :  { %v1112_v42 = vadd.f32 1e-12, %v1110_v40  ;;  %v1111_v43 = vmul.f32 0.0078125, %v1109_v41 }
 0xb3c   :  { %2985 = vrsqrt.f32 %v1112_v42  ;;  %v1113_v44 = vadd.f32 1e-12, %v1111_v43 }
 0xb3e   :  { %2987 = vrsqrt.f32 %v1113_v44 }
 0xb46   :  { %v2986_v45 = vpop.eup %2985 }
 0xb47   :  { %v1116_v47 = vmul.f32 %v2986_v45, %v1102_v11 }
 0xb48   :  { %v2988_v48 = vpop.eup %2987 }
 0xb49   :  { %v1117_v49 = vmul.f32 %v2988_v48, %v1103_v14  ;;  %v1118_v52 = vmul.f32 %v1116_v47, %v1094_v46 }
 0xb4b   :  { %v1119_v57 = vmul.f32 %v1117_v49, %v1094_v46  ;;  %v3391_v59 = vadd.f32 %v1118_v52, %v1095_v53 }
 0xb4d   :  { %v3393_v60 = vadd.f32 %v1119_v57, %v1095_v53 }
 0xb4f   :  { %v1171_v61 = vpack.c.bf16 %v3393_v60, %v3391_v59 }
 0xb51   :  { %1351 = vmatmul.mubr.bf16.vlgmr.msra.gmra.mrb[16].mxu1 %v1171_v61  ;;  %2675 = vmatmul.mubr.bf16.vlgmr.msra.gmra.mrb[20].mxu0 %v1171_v61 }
 0xb52   :  { %2680 = vmatprep.mubr.msk.bf16.mxu1 %vm3124_vm0, %v3122_v4  ;;  %2718 = vmatprep.mubr.msk.bf16.mxu0 %vm3124_vm0, %v3122_v4 }
 0xc24   :  { %v1352_v1 = vpop.f32.mrb[16].mxu1  ;;  %v1395_v2 = vpop.f32.mrb[20].mxu0 }
 0xc25   :  { %v1354_v5 = vpop.f32.mrb[17].mxu1  ;;  %v2676_v6 = vpop.f32.mrb[21].mxu0  ;;  %v1353_v9 = vadd.f32 %v1352_v1, %v1178_v63  ;;  %v1396_v50 = vadd.f32 %v1395_v2, %v1186_v0 }
 0xc26   :  { %v1356_v7 = vpop.f32.mrb[18].mxu1  ;;  %v1398_v8 = vpop.f32.mrb[22].mxu0  ;;  %v1355_v11 = vadd.f32 %v1354_v5, %v1182_v3 }
 0xc27   :  { %v1357_v51 = vadd.f32 %v1356_v7, %v1178_v63  ;;  %v1399_v38 = vadd.f32 %v1398_v8, %v1186_v0  ;;  %v1358_v10 = vpop.f32.mrb[19].mxu1  ;;  %v2677_v39 = vpop.f32.mrb[23].mxu0 }
 0xc28   :  { %v1359_v12 = vadd.f32 %v1358_v10, %v1182_v3 }
 0xc29   :  { %v1402_v14 = vpack.c.bf16 %v1357_v51, %v1353_v9  ;;  %v3405_v15 = vpack.c.bf16 %v1399_v38, %v1396_v50 }
 0xc2a   :  { %v1403_v54 = vpack.c.bf16 %v1359_v12, %v1355_v11 }
 0xc2c   :  { %v1409_v56 = vsel %vm384_vm1, %v1403_v54, 0 }
 0xc2d   :  { %2679 = vmatpush3.bf16.xpose.msra.mxu1 %v1409_v56 }
 0xc2e   :  { %2684 = vmatprep.subr.bf16.mxu1 %v3122_v4 }
 0xc34   :  { %2681 = vmatmul.mubr.msk.bf16.vlgmr.msra.gmra.mrb[20].mxu1 %vm384_vm1, %v1402_v14 }
 0xc35   :  { %2685 = vmatpush3.bf16.msra.mxu1 %v3405_v15  ;;  %2686 = vmatprep.mubr.msk.bf16.mxu1 %vm3124_vm0, %v3122_v4 }
 0xc36   :  { %2690 = vmatprep.subr.bf16.mxu1 %v3122_v4 }
 0xd07   :  { %v1445_v16 = vpop.f32.mrb[20].mxu1 }
 0xd08   :  { %v1452_v17 = vmul.f32 0.125, %v1445_v16  ;;  %v2682_v18 = vpop.f32.mrb[21].mxu1 }
 0xd09   :  { %v1448_v19 = vpop.f32.mrb[22].mxu1 }
 0xd0a   :  { %v1453_v20 = vmul.f32 0.125, %v1448_v19  ;;  %v2683_v21 = vpop.f32.mrb[23].mxu1  ;;  %v1454_v22 = vadd.f32 %v1452_v17, %v3289_v29 }
 0xd0b   :  { %v2897_v21 = vld [vmem:[#allocation5 + $0x18c] ss:$24 sps:$4 sm:$0xff]  }
 0xd0c   :  { %v1456_v23 = vsel %vm436_vm2, %v1454_v22, -inf  ;;  %v1455_v24 = vadd.f32 %v1453_v20, %v3294_v34  ;;  %2703 = vmatpush3.bf16.msra.mxu0 %v2897_v21 }
 0xd0d   :  { %1457 = vmax.xlane.f32.xlu0 %v1456_v23  ;;  %2704 = vmatprep.subr.bf16.mxu0 %v3122_v4  ;;  %v2900_v23 = vld [vmem:[#allocation5 + $0x21c] ss:$24 sps:$4 sm:$0xff]  }
 0xd0e   :  { %v1459_v13 = vsel %vm436_vm2, %v1455_v24, -inf }
 0xd0f   :  { %1460 = vmax.xlane.f32.xlu1 %v1459_v13  ;;  %v2902_v13 = vld [vmem:[#allocation5 + $0x27c] ss:$24 sps:$4 sm:$0xff]  }
 0xd9a   :  { %v1458_v25 = vpop.xlane.xlu0 %1457 }
 0xd9b   :  { %v1462_v26 = vsub.f32 %v1454_v22, %v1458_v25  ;;  %v2898_v22 = vld [vmem:[#allocation5 + $0x1bc] ss:$24 sps:$4 sm:$0xff]  }
 0xd9c   :  { %v1461_v27 = vpop.xlane.xlu1 %1460  ;;  %2705 = vmatpush3.bf16.msra.mxu0 %v2898_v22  ;;  %v2904_v25 = vld [vmem:[#allocation5 + $0x2dc] ss:$24 sps:$4 sm:$0xff]  }
 0xd9d   :  { %v1464_v28 = vmul.f32 1.442695, %v1462_v26  ;;  %v1463_v31 = vsub.f32 %v1455_v24, %v1461_v27  ;;  %2706 = vmatprep.subr.bf16.mxu0 %v3122_v4  ;;  %v2901_v24 = vld [vmem:[#allocation5 + $0x24c] ss:$24 sps:$4 sm:$0xff]  }
 0xd9f   :  { %2989 = vpow2.f32 %v1464_v28  ;;  %v1466_v32 = vmul.f32 1.442695, %v1463_v31 }
 0xda1   :  { %2991 = vpow2.f32 %v1466_v32 }
 0xda9   :  { %v2990_v33 = vpop.eup %2989 }
 0xdaa   :  { %v1468_v35 = vsel %vm436_vm2, %v2990_v33, 0.0 }
 0xdab   :  { %v2992_v36 = vpop.eup %2991  ;;  %1469 = vadd.xlane.f32.xlu0 %v1468_v35 }
 0xdac   :  { %v1471_v37 = vsel %vm436_vm2, %v2992_v36, 0.0 }
 0xdad   :  { %1472 = vadd.xlane.f32.xlu1 %v1471_v37 }
 0xdbe   :  { %1524 = vrot.lane.b32.xlu1 %v1402_v14, %s3120_s3 }
 0xdc1   :  { %1527 = vrot.lane.b32.xlu0 %v1403_v54, %s3120_s3 }
 0xe38   :  { %v1470_v40 = vpop.xlane.xlu0 %1469 }
 0xe39   :  { %2993 = vrcp.f32 %v1470_v40 }
 0xe3a   :  { %v1473_v41 = vpop.xlane.xlu1 %1472 }
 0xe3b   :  { %2995 = vrcp.f32 %v1473_v41 }
 0xe3c   :  { %v1528_v46 = vpop.permute.xlu0 %1527 }
 0xe3d   :  { %v1533_v48 = vsel %vm384_vm1, %v1528_v46, 0 }
 0xe3e   :  { %v1525_v49 = vpop.permute.xlu1 %1524 }
 0xe43   :  { %v2994_v42 = vpop.eup %2993 }
 0xe44   :  { %v1476_v44 = vmul.f32 %v2994_v42, %v2990_v33  ;;  %v1662_v42 = vld [vmem:[#allocation2 + $0x1c] ss:$0 sm:$0xff] }
 0xe45   :  { %v2996_v43 = vpop.eup %2995 }
 0xe46   :  { %v1477_v45 = vmul.f32 %v2996_v43, %v2992_v36 }
 0xe48   :  { %v1478_v47 = vpack.c.bf16 %v1477_v45, %v1476_v44 }
 0xe4a   :  { %2687 = vmatmul.mubr.msk.bf16.vlgmr.msra.gmra.mrb[24].mxu1 %vm436_vm2, %v1478_v47 }
 0xe4b   :  { %2691 = vmatpush3.bf16.xpose.msra.mxu1 %v1533_v48  ;;  %2692 = vmatprep.mubr.msk.bf16.mxu1 %vm3124_vm0, %v3122_v4 }
 0xe4c   :  { %2696 = vmatprep.subr.bf16.mxu1 %v3122_v4 }
 0xe52   :  { %2693 = vmatmul.mubr.msk.bf16.vlgmr.msra.gmra.mrb[28].mxu1 %vm384_vm1, %v1525_v49 }
 0xe53   :  { %2698 = vmatprep.mubr.msk.bf16.mxu1 %vm3124_vm0, %v3122_v4 }
 0xf1d   :  { %v3430_v52 = vpop.f32.mrb[24].mxu1 }
 0xf1e   :  { %v2688_v53 = vpop.f32.mrb[25].mxu1 }
 0xf1f   :  { %v3432_v57 = vpop.f32.mrb[26].mxu1 }
 0xf20   :  { %v2689_v61 = vpop.f32.mrb[27].mxu1 }
 0xf21   :  { %v2905_v61 = vld [vmem:[#allocation5 + $0x190] ss:$24 sps:$4 sm:$0xff]  }
 0xf25   :  { %v1569_v62 = vpop.f32.mrb[28].mxu1 }
 0xf26   :  { %v1576_v63 = vmul.f32 0.125, %v1569_v62  ;;  %v2694_v0 = vpop.f32.mrb[29].mxu1  ;;  %v2910_v62 = vld [vmem:[#allocation5 + $0x1c4] ss:$24 sps:$4 sm:$0xff]  }
 0xf27   :  { %v1572_v1 = vpop.f32.mrb[30].mxu1 }
 0xf28   :  { %v1577_v2 = vmul.f32 0.125, %v1572_v1  ;;  %v2695_v3 = vpop.f32.mrb[31].mxu1  ;;  %v1578_v5 = vadd.f32 %v1576_v63, %v3289_v29 }
 0xf2a   :  { %v1580_v6 = vsel %vm436_vm2, %v1578_v5, -inf  ;;  %v1579_v7 = vadd.f32 %v1577_v2, %v3294_v34 }
 0xf2b   :  { %1581 = vmax.xlane.f32.xlu1 %v1580_v6 }
 0xf2c   :  { %v1583_v8 = vsel %vm436_vm2, %v1579_v7, -inf }
 0xf2d   :  { %1584 = vmax.xlane.f32.xlu0 %v1583_v8  ;;  %v2916_v8 = vld [vmem:[#allocation5 + $0x224] ss:$24 sps:$4 sm:$0xff]  }
 0xfb8   :  { %v1582_v9 = vpop.xlane.xlu1 %1581 }
 0xfb9   :  { %v1586_v50 = vsub.f32 %v1578_v5, %v1582_v9  ;;  %v2914_v9 = vld [vmem:[#allocation5 + $0x220] ss:$24 sps:$4 sm:$0xff]  }
 0xfba   :  { %v1585_v51 = vpop.xlane.xlu0 %1584 }
 0xfbb   :  { %v1588_v38 = vmul.f32 1.442695, %v1586_v50  ;;  %v1587_v10 = vsub.f32 %v1579_v7, %v1585_v51  ;;  %v2911_v7 = vld [vmem:[#allocation5 + $0x1f0] ss:$24 sps:$4 sm:$0xff]   ;;  %v2919_v50 = vld [vmem:[#allocation5 + $0x254] ss:$24 sps:$4 sm:$0xff]  }
 0xfbc   :  { %v2917_v51 = vld [vmem:[#allocation5 + $0x250] ss:$24 sps:$4 sm:$0xff]  }
 0xfbd   :  { %2997 = vpow2.f32 %v1588_v38  ;;  %v1590_v39 = vmul.f32 1.442695, %v1587_v10  ;;  %v2922_v38 = vld [vmem:[#allocation5 + $0x284] ss:$24 sps:$4 sm:$0xff]   ;;  %v2920_v10 = vld [vmem:[#allocation5 + $0x280] ss:$24 sps:$4 sm:$0xff]  }
 0xfbf   :  { %2999 = vpow2.f32 %v1590_v39  ;;  %v2925_v39 = vld [vmem:[#allocation5 + $0x2b4] ss:$24 sps:$4 sm:$0xff]  }
 0xfc7   :  { %v2998_v11 = vpop.eup %2997 }
 0xfc8   :  { %v1592_v12 = vsel %vm436_vm2, %v2998_v11, 0.0 }
 0xfc9   :  { %v3000_v29 = vpop.eup %2999  ;;  %1593 = vadd.xlane.f32.xlu0 %v1592_v12  ;;  %v2928_v12 = vld [vmem:[#allocation5 + $0x2e4] ss:$24 sps:$4 sm:$0xff]  }
 0xfca   :  { %v1595_v14 = vsel %vm436_vm2, %v3000_v29, 0.0 }
 0xfcb   :  { %1596 = vadd.xlane.f32.xlu1 %v1595_v14 }
 0xfdf   :  { %1604 = vrot.lane.b32.xlu0 %v3405_v15, %s3120_s3  ;;  %v2899_v15 = vld [vmem:[#allocation5 + $0x1ec] ss:$24 sps:$4 sm:$0xff]  }
 0xfe0   :  { %2707 = vmatpush3.bf16.msra.mxu0 %v2899_v15 }
 0xfe1   :  { %2708 = vmatprep.subr.bf16.mxu0 %v3122_v4 }
 0xfe4   :  { %2709 = vmatpush3.bf16.msra.mxu0 %v2900_v23  ;;  %v1739_v23 = vld [vmem:[#allocation2 + $0x1e] ss:$0 sm:$0xff] }
 0xfe5   :  { %2710 = vmatprep.subr.bf16.mxu0 %v3122_v4 }
 0xfe8   :  { %2711 = vmatpush3.bf16.msra.mxu0 %v2901_v24 }
 0xfe9   :  { %2712 = vmatprep.subr.bf16.mxu0 %v3122_v4 }
 0xfec   :  { %2713 = vmatpush3.bf16.msra.mxu0 %v2902_v13 }
 0xfed   :  { %2714 = vmatprep.subr.bf16.mxu0 %v3122_v4 }
0x1056   :  { %v1594_v34 = vpop.xlane.xlu0 %1593 }
0x1057   :  { %3001 = vrcp.f32 %v1594_v34 }
0x1058   :  { %v1597_v54 = vpop.xlane.xlu1 %1596 }
0x1059   :  { %3003 = vrcp.f32 %v1597_v54 }
0x105a   :  { %v1605_v56 = vpop.permute.xlu0 %1604 }
0x105b   :  { %2697 = vmatpush3.bf16.msra.mxu1 %v1605_v56 }
0x1061   :  { %v3002_v16 = vpop.eup %3001 }
0x1062   :  { %v1600_v18 = vmul.f32 %v3002_v16, %v2998_v11  ;;  %v2923_v11 = vld [vmem:[#allocation5 + $0x2b0] ss:$24 sps:$4 sm:$0xff]  }
0x1063   :  { %v3004_v17 = vpop.eup %3003 }
0x1064   :  { %v1601_v19 = vmul.f32 %v3004_v17, %v3000_v29  ;;  %v2926_v29 = vld [vmem:[#allocation5 + $0x2e0] ss:$24 sps:$4 sm:$0xff]  }
0x1066   :  { %v1602_v20 = vpack.c.bf16 %v1601_v19, %v1600_v18  ;;  %v1738_v19 = vld [vmem:[#allocation2 + $0x1d] ss:$0 sm:$0xff] }
0x1068   :  { %2699 = vmatmul.mubr.msk.bf16.vlgmr.msra.gmra.mrb[32].mxu1 %vm436_vm2, %v1602_v20 }
0x1069   :  { %1892 = vmatprep.mubr.bf16.mxu1 %v3123_v30  ;;  %v2903_v30 = vld [vmem:[#allocation5 + $0x2ac] ss:$24 sps:$4 sm:$0xff]  }
0x106a   :  { %2715 = vmatpush3.bf16.msra.mxu0 %v2903_v30 }
0x106b   :  { %2716 = vmatprep.subr.bf16.mxu0 %v3122_v4 }
0x106e   :  { %2717 = vmatpush3.bf16.msra.mxu0 %v2904_v25 }
0x113b   :  { %v1644_v26 = vpop.f32.mrb[32].mxu1 }
0x113c   :  { %v2700_v27 = vpop.f32.mrb[33].mxu1 }
0x113d   :  { %v1647_v28 = vpop.f32.mrb[34].mxu1  ;;  %v2930_v27 = vld [vmem:[%s3550_s5 + $0x80] sm:$0xff]  }
0x113e   :  { %v2764_v31 = vpack.i.bf16 %v1647_v28, %v1644_v26  ;;  %v2701_v32 = vpop.f32.mrb[35].mxu1  ;;  %v2929_v26 = vld [vmem:[%s3550_s5 + $0xc0] sm:$0xff]   ;;  %v2931_v28 = vld [vmem:[%s3550_s5 + $0xc8] sm:$0xff]  }
0x113f   :  { %2561 = vmatprep.subr.bf16.mxu0 %v2929_v26  ;;  %v2933_v32 = vld [vmem:[%s3550_s5 + $0xd0] sm:$0xff]  }
0x1140   :  { %2765 = vrot.lane.b32.xlu1 %v2764_v31, %s3120_s3  ;;  %v2932_v31 = vld [vmem:[%s3550_s5 + $0x88] sm:$0xff]  }
0x11b2   :  { %v2766_v33 = vpop.permute.xlu1 %2765 }
0x11b3   :  { %v2768_v35 = vunpack.i.h.bf16 %v2766_v33  ;;  %v2767_v36 = vunpack.i.l.bf16 %v2766_v33  ;;  %v2934_v33 = vld [vmem:[%s3550_s5 + $0x90] sm:$0xff]  }
0x11b5   :  { %v1660_v37 = vsel %vm384_vm1, %v3432_v57, %v2768_v35  ;;  %v1659_v40 = vsel %vm384_vm1, %v3430_v52, %v2767_v36  ;;  %v2907_v57 = vld [vmem:[#allocation5 + $0x194] ss:$24 sps:$4 sm:$0xff]   ;;  %v2908_v52 = vld [vmem:[#allocation5 + $0x1c0] ss:$24 sps:$4 sm:$0xff]  }
0x11b6   :  { %v1661_v41 = vpack.c.bf16 %v1660_v37, %v1659_v40  ;;  %1860 = vmatprep.subr.bf16.mxu1 %v2907_v57  ;;  %v2935_v35 = vld [vmem:[%s3550_s5 + $0xd8] sm:$0xff]   ;;  %v2937_v37 = vld [vmem:[%s3550_s5 + $0xe0] sm:$0xff]  }
0x11b7   :  { %1861 = vmatpush1.bf16.msra.mxu1 %v2905_v61  ;;  %v2936_v36 = vld [vmem:[%s3550_s5 + $0x98] sm:$0xff]   ;;  %v2938_v40 = vld [vmem:[%s3550_s5 + $0xa0] sm:$0xff]  }
0x11b8   :  { %2719 = vmatmul.mubr.bf16.vlgmr.msra.gmra.mrb[24].mxu0 %v1661_v41  ;;  %1862 = vmatprep.subr.bf16.mxu1 %v2910_v62  ;;  %v2939_v41 = vld [vmem:[%s3550_s5 + $0xe8] sm:$0xff]  }
0x11b9   :  { %2562 = vmatpush3.bf16.msra.mxu0 %v2930_v27 }
0x11ba   :  { %2563 = vmatprep.subr.bf16.mxu0 %v2931_v28 }
0x11bb   :  { %1863 = vmatpush1.bf16.msra.mxu1 %v2908_v52 }
0x11bd   :  { %2564 = vmatpush3.bf16.msra.mxu0 %v2932_v31 }
0x11be   :  { %2565 = vmatprep.subr.bf16.mxu0 %v2933_v32 }
0x11c1   :  { %2566 = vmatpush3.bf16.msra.mxu0 %v2934_v33  ;;  %v1974_v33 = vld [vmem:[#allocation2 + $0x30] ss:$0 sm:$0xff] }
0x11c2   :  { %2567 = vmatprep.subr.bf16.mxu0 %v2935_v35 }
0x11c5   :  { %2568 = vmatpush3.bf16.msra.mxu0 %v2936_v36 }
0x11c6   :  { %2569 = vmatprep.subr.bf16.mxu0 %v2937_v37 }
0x11c9   :  { %2570 = vmatpush3.bf16.msra.mxu0 %v2938_v40 }
0x11ca   :  { %2571 = vmatprep.subr.bf16.mxu0 %v2939_v41 }
0x128b   :  { %v1729_v43 = vpop.f32.mrb[24].mxu0 }
0x128c   :  { %v1730_v44 = vadd.f32 %v1729_v43, %v1662_v42  ;;  %v2720_v45 = vpop.f32.mrb[25].mxu0  ;;  %v2941_v43 = vld [vmem:[%s3550_s5 + $0xf0] sm:$0xff]  }
0x128d   :  { %v1732_v46 = vpop.f32.mrb[26].mxu0  ;;  %v2943_v45 = vld [vmem:[%s3550_s5 + $0xf8] sm:$0xff]  }
0x128e   :  { %v1733_v47 = vadd.f32 %v1732_v46, %v1662_v42  ;;  %v2721_v48 = vpop.f32.mrb[27].mxu0  ;;  %v1736_v49 = vadd.f32 %v1730_v44, %v3391_v59  ;;  %v2940_v42 = vld [vmem:[%s3550_s5 + $0xa8] sm:$0xff]   ;;  %v2942_v44 = vld [vmem:[%s3550_s5 + $0xb0] sm:$0xff]   ;;  %v2944_v46 = vld [vmem:[%s3550_s5 + $0xb8] sm:$0xff]  }
0x128f   :  { %2572 = vmatpush3.bf16.msra.mxu0 %v2940_v42 }
0x1290   :  { %1740 = vadd.xlane.f32.xlu1 %v1736_v49  ;;  %v1737_v53 = vadd.f32 %v1733_v47, %v3393_v60  ;;  %v2913_v60 = vld [vmem:[#allocation5 + $0x1f4] ss:$24 sps:$4 sm:$0xff]   ;;  %2573 = vmatprep.subr.bf16.mxu0 %v2941_v43 }
0x1291   :  { %1864 = vmatprep.subr.bf16.mxu1 %v2913_v60  ;;  %v1768_v47 = vld [vmem:[#allocation2 + $0x1f] ss:$8 sm:$0x3] }
0x1292   :  { %1742 = vadd.xlane.f32.xlu0 %v1737_v53  ;;  %1865 = vmatpush1.bf16.msra.mxu1 %v2911_v7  ;;  %v1773_v48 = vrot.slane %v1768_v47, %v3253_v55 }
0x1293   :  { %1866 = vmatprep.subr.bf16.mxu1 %v2916_v8  ;;  %2574 = vmatpush3.bf16.msra.mxu0 %v2942_v44 }
0x1294   :  { %2575 = vmatprep.subr.bf16.mxu0 %v2943_v45 }
0x1296   :  { %1867 = vmatpush1.bf16.msra.mxu1 %v2914_v9 }
0x1297   :  { %1868 = vmatprep.subr.bf16.mxu1 %v2919_v50  ;;  %2576 = vmatpush3.bf16.msra.mxu0 %v2944_v46 }
0x129a   :  { %1869 = vmatpush1.bf16.msra.mxu1 %v2917_v51 }
0x129b   :  { %1870 = vmatprep.subr.bf16.mxu1 %v2922_v38 }
0x129e   :  { %1871 = vmatpush1.bf16.msra.mxu1 %v2920_v10 }
0x129f   :  { %1872 = vmatprep.subr.bf16.mxu1 %v2925_v39 }
0x12a2   :  { %1873 = vmatpush1.bf16.msra.mxu1 %v2923_v11 }
0x12a3   :  { %1874 = vmatprep.subr.bf16.mxu1 %v2928_v12 }
0x12a6   :  { %1875 = vmatpush1.bf16.msra.mxu1 %v2926_v29 }
0x12a7   :  { %2722 = vmatprep.subr.bf16.mxu1 %v3122_v4 }
0x131d   :  { %v1741_v63 = vpop.xlane.xlu1 %1740 }
0x131e   :  { %v1744_v0 = vmul.f32 0.0078125, %v1741_v63 }
0x131f   :  { %v1743_v1 = vpop.xlane.xlu0 %1742 }
0x1320   :  { %v1746_v2 = vsub.f32 %v1736_v49, %v1744_v0  ;;  %v1745_v3 = vmul.f32 0.0078125, %v1743_v1  ;;  %v1777_v49 = vrot.slane %v1768_v47, %v3257_v58 }
0x1322   :  { %v1747_v5 = vsub.f32 %v1737_v53, %v1745_v3  ;;  %v1748_v6 = vmul.f32 %v1746_v2, %v1746_v2 }
0x1324   :  { %1750 = vadd.xlane.f32.xlu0 %v1748_v6  ;;  %v1749_v59 = vmul.f32 %v1747_v5, %v1747_v5 }
0x1326   :  { %1752 = vadd.xlane.f32.xlu1 %v1749_v59 }
0x13b1   :  { %v1751_v14 = vpop.xlane.xlu0 %1750 }
0x13b2   :  { %v1754_v34 = vmul.f32 0.0078125, %v1751_v14 }
0x13b3   :  { %v1753_v54 = vpop.xlane.xlu1 %1752 }
0x13b4   :  { %v1756_v56 = vadd.f32 1e-12, %v1754_v34  ;;  %v1755_v16 = vmul.f32 0.0078125, %v1753_v54 }
0x13b6   :  { %3005 = vrsqrt.f32 %v1756_v56  ;;  %v1757_v17 = vadd.f32 1e-12, %v1755_v16 }
0x13b8   :  { %3007 = vrsqrt.f32 %v1757_v17 }
0x13c0   :  { %v3006_v18 = vpop.eup %3005 }
0x13c1   :  { %v1760_v20 = vmul.f32 %v3006_v18, %v1746_v2 }
0x13c2   :  { %v3008_v21 = vpop.eup %3007 }
0x13c3   :  { %v1761_v22 = vmul.f32 %v3008_v21, %v1747_v5  ;;  %v1762_v15 = vmul.f32 %v1760_v20, %v1738_v19 }
0x13c5   :  { %v1763_v24 = vmul.f32 %v1761_v22, %v1738_v19  ;;  %v3459_v13 = vadd.f32 %v1762_v15, %v1739_v23 }
0x13c7   :  { %v3461_v30 = vadd.f32 %v1763_v24, %v1739_v23 }
0x13c9   :  { %v1766_v25 = vpack.c.bf16 %v3461_v30, %v3459_v13 }
0x13cb   :  { %1893 = vmatmul.mubr.bf16.vlgmr.msra.gmra.mrb[36].mxu1 %v1766_v25 }
0x13cc   :  { %2724 = vmatprep.mubr.msk.bf16.mxu1 %vm3124_vm0, %v3122_v4 }
0x149e   :  { %v1894_v53 = vpop.f32.mrb[36].mxu1 }
0x149f   :  { %v1895_v61 = vadd.f32 %v1894_v53, %v1773_v48  ;;  %v1896_v57 = vpop.f32.mrb[37].mxu1 }
0x14a0   :  { %v1897_v62 = vadd.f32 %v1896_v57, %v1777_v49  ;;  %v1898_v52 = vpop.f32.mrb[38].mxu1 }
0x14a1   :  { %v1903_v63 = vmul.f32 %v1895_v61, %v1895_v61  ;;  %v1899_v0 = vadd.f32 %v1898_v52, %v1773_v48  ;;  %v1900_v1 = vpop.f32.mrb[39].mxu1 }
0x14a2   :  { %v1904_v2 = vmul.f32 %v1897_v62, %v1897_v62  ;;  %v1901_v3 = vadd.f32 %v1900_v1, %v1777_v49 }
0x14a3   :  { %v1907_v5 = vmul.f32 %v1903_v63, %v1895_v61  ;;  %v1905_v6 = vmul.f32 %v1899_v0, %v1899_v0 }
0x14a4   :  { %v1908_v59 = vmul.f32 %v1904_v2, %v1897_v62  ;;  %v1906_v60 = vmul.f32 %v1901_v3, %v1901_v3 }
0x14a5   :  { %v1911_v7 = vmul.f32 0.044715, %v1907_v5  ;;  %v1909_v8 = vmul.f32 %v1905_v6, %v1899_v0 }
0x14a6   :  { %v1912_v9 = vmul.f32 0.044715, %v1908_v59  ;;  %v1910_v55 = vmul.f32 %v1906_v60, %v1901_v3 }
0x14a7   :  { %v1915_v50 = vadd.f32 %v1911_v7, %v1895_v61  ;;  %v1913_v58 = vmul.f32 0.044715, %v1909_v8  ;;  %v2115_v7 = vld [vmem:[#allocation2 + $0x32] ss:$0 sm:$0xff] }
0x14a8   :  { %v1916_v51 = vadd.f32 %v1912_v9, %v1897_v62  ;;  %v1914_v38 = vmul.f32 0.044715, %v1910_v55 }
0x14a9   :  { %v1919_v10 = vmul.f32 0.7978846, %v1915_v50  ;;  %v1917_v39 = vadd.f32 %v1913_v58, %v1899_v0  ;;  %v2142_v58 = vld [vmem:[%s3547_s2] sm:$0x1]  ;;  %s3125_s2 = smov [#allocation8]  }
0x14aa   :  { %v1920_v11 = vmul.f32 0.7978846, %v1916_v51  ;;  %v1918_v12 = vadd.f32 %v1914_v38, %v1901_v3  ;;  %v2945_v51 = vld [vmem:[#allocation7] sm:$0xff]   ;;  %v2946_v38 = vld [vmem:[#allocation7 + $0x8] sm:$0xff]   ;;  %s2300_s30 = sshll.u32 %s3125_s2, 4  ;;  %s2301_s30 = int_to_ptr.vmem [resolvable:$true] %s2300_s30 }
0x14ab   :  { %3009 = vtanh.f32 %v1919_v10  ;;  %v1921_v29 = vmul.f32 0.7978846, %v1917_v39  ;;  %v2947_v10 = vld [vmem:[#allocation7 + $0x10] sm:$0xff]   ;;  %v2948_v39 = vld [vmem:[#allocation7 + $0x18] sm:$0xff]   ;;  %s3087_s8 = scalar_lea.vmem %s2301_s30, 32  ;;  %p3092_p11 = scmp.lt.s32.totalorder %s2301_s30, %s2301_s30 }
0x14ac   :  { %3011 = vtanh.f32 %v1920_v11  ;;  %v1922_v14 = vmul.f32 0.7978846, %v1918_v12  ;;  %v2949_v11 = vld [vmem:[#allocation7 + $0x20] sm:$0xff]   ;;  %v2950_v12 = vld [vmem:[#allocation7 + $0x28] sm:$0xff]   ;;  %p3088_p10 = scmp.ne.s32.totalorder %s2301_s30, %s3087_s8  ;;  %p3093_p12 = scmp.lt.s32.totalorder %s3087_s8, %s3087_s8 }
0x14ad   :  { %3013 = vtanh.f32 %v1921_v29  ;;  %v2951_v29 = vld [vmem:[#allocation7 + $0x30] sm:$0xff]  }
0x14ae   :  { %3015 = vtanh.f32 %v1922_v14  ;;  %v2952_v14 = vld [vmem:[#allocation7 + $0x38] sm:$0xff]   ;;  %p3094_p13 = por %p3093_p12, %p3092_p11 }
0x14b0   :  { %p3095_p0 = pnand %p3094_p13, %p3088_p10 }
0x14b5   :  { %v3010_v34 = vpop.eup %3009 }
0x14b6   :  { %v3012_v54 = vpop.eup %3011  ;;  %v1927_v56 = vadd.f32 1.0, %v3010_v34 }
0x14b7   :  { %v3014_v16 = vpop.eup %3013  ;;  %v1928_v17 = vadd.f32 1.0, %v3012_v54 }
0x14b8   :  { %v3016_v18 = vpop.eup %3015  ;;  %v1931_v19 = vmul.f32 0.5, %v1927_v56  ;;  %v1929_v20 = vadd.f32 1.0, %v3014_v16 }
0x14b9   :  { %v1930_v21 = vadd.f32 1.0, %v3016_v18  ;;  %v1932_v22 = vmul.f32 0.5, %v1928_v17  ;;  %v2204_v18 = vld [vmem:[#allocation2 + $0x2] ss:$0 sm:$0xff] }
0x14ba   :  { %v1933_v15 = vmul.f32 0.5, %v1929_v20  ;;  %v1935_v24 = vmul.f32 %v1931_v19, %v1895_v61 }
0x14bb   :  { %v1934_v23 = vmul.f32 0.5, %v1930_v21  ;;  %v1936_v26 = vmul.f32 %v1932_v22, %v1897_v62 }
0x14bc   :  { %v1937_v25 = vmul.f32 %v1933_v15, %v1899_v0 }
0x14bd   :  { %v1938_v27 = vmul.f32 %v1934_v23, %v1901_v3  ;;  %v2114_v3 = vld [vmem:[#allocation2 + $0x31] ss:$0 sm:$0xff] }
0x14be   :  { %v1972_v28 = vpack.c.bf16 %v1937_v25, %v1935_v24 }
0x14bf   :  { %v1973_v31 = vpack.c.bf16 %v1938_v27, %v1936_v26 }
0x14c1   :  { %2103 = vmatprep.mubr.bf16.mxu0 %v1973_v31 }
0x14c2   :  { %2104 = vmatmul.mubr.bf16.vlgmr.msra.gmra.mrb[28].mxu0 %v1972_v28 }
0x1595   :  { %v2577_v32 = vpop.f32.mrb[28].mxu0 }
0x1596   :  { %v2578_v35 = vpop.f32.mrb[29].mxu0 }
0x1597   :  { %v2579_v36 = vadd.f32 %v2578_v35, %v2577_v32  ;;  %v2580_v37 = vpop.f32.mrb[30].mxu0 }
0x1598   :  { %v2581_v40 = vpop.f32.mrb[31].mxu0 }
0x1599   :  { %v2106_v41 = vadd.f32 %v2579_v36, %v1974_v33  ;;  %v2582_v42 = vadd.f32 %v2581_v40, %v2580_v37 }
0x159b   :  { %v2109_v43 = vadd.f32 %v2582_v42, %v1974_v33  ;;  %v2112_v44 = vadd.f32 %v2106_v41, %v3459_v13 }
0x159d   :  { %2116 = vadd.xlane.f32.xlu0 %v2112_v44  ;;  %v2113_v45 = vadd.f32 %v2109_v43, %v3461_v30 }
0x159f   :  { %2118 = vadd.xlane.f32.xlu1 %v2113_v45 }
0x162a   :  { %v2117_v46 = vpop.xlane.xlu0 %2116 }
0x162b   :  { %v2120_v47 = vmul.f32 0.0078125, %v2117_v46 }
0x162c   :  { %v2119_v48 = vpop.xlane.xlu1 %2118 }
0x162d   :  { %v2122_v49 = vsub.f32 %v2112_v44, %v2120_v47  ;;  %v2121_v53 = vmul.f32 0.0078125, %v2119_v48 }
0x162f   :  { %v2123_v61 = vsub.f32 %v2113_v45, %v2121_v53  ;;  %v2124_v57 = vmul.f32 %v2122_v49, %v2122_v49 }
0x1631   :  { %2126 = vadd.xlane.f32.xlu0 %v2124_v57  ;;  %v2125_v62 = vmul.f32 %v2123_v61, %v2123_v61 }
0x1633   :  { %2128 = vadd.xlane.f32.xlu1 %v2125_v62 }
0x16be   :  { %v2127_v52 = vpop.xlane.xlu0 %2126 }
0x16bf   :  { %v2130_v63 = vmul.f32 0.0078125, %v2127_v52 }
0x16c0   :  { %v2129_v0 = vpop.xlane.xlu1 %2128 }
0x16c1   :  { %v2132_v1 = vadd.f32 1e-12, %v2130_v63  ;;  %v2131_v2 = vmul.f32 0.0078125, %v2129_v0 }
0x16c3   :  { %3017 = vrsqrt.f32 %v2132_v1  ;;  %v2133_v13 = vadd.f32 1e-12, %v2131_v2 }
0x16c5   :  { %3019 = vrsqrt.f32 %v2133_v13 }
0x16cd   :  { %v3018_v30 = vpop.eup %3017 }
0x16ce   :  { %v2136_v5 = vmul.f32 %v3018_v30, %v2122_v49 }
0x16cf   :  { %v3020_v6 = vpop.eup %3019 }
0x16d0   :  { %v2137_v59 = vmul.f32 %v3020_v6, %v2123_v61  ;;  %v2138_v60 = vmul.f32 %v2136_v5, %v2114_v3 }
0x16d2   :  { %v2139_v8 = vmul.f32 %v2137_v59, %v2114_v3  ;;  %v2140_v9 = vadd.f32 %v2138_v60, %v2115_v7 }
0x16d4   :  { %v2141_v55 = vadd.f32 %v2139_v8, %v2115_v7 }
0x16d6   :  { %v2143_v50 = vpack.c.bf16 %v2141_v55, %v2140_v9 }
0x16d8   :  { %2723 = vmatpush3.bf16.msra.mxu1 %v2143_v50 }
0x16d9   :  { %2728 = vmatprep.subr.bf16.mxu1 %v3122_v4 }
0x16db   :  { %2725 = vmatmul.mubr.msk.bf16.vlgmr.msra.gmra.mrb[40].mxu1 %vm436_vm2, %v2142_v58 }
0x16dc   :  { %2729 = vmatpush3.bf16.msra.mxu1 %v2945_v51  ;;  %2744 = vmatprep.mubr.msk.bf16.mxu1 %vm3124_vm0, %v3122_v4 }
0x16dd   :  { %2730 = vmatprep.subr.bf16.mxu1 %v3122_v4 }
0x16e0   :  { %2731 = vmatpush3.bf16.msra.mxu1 %v2946_v38 }
0x16e1   :  { %2732 = vmatprep.subr.bf16.mxu1 %v3122_v4 }
0x16e4   :  { %2733 = vmatpush3.bf16.msra.mxu1 %v2947_v10 }
0x16e5   :  { %2734 = vmatprep.subr.bf16.mxu1 %v3122_v4 }
0x16e8   :  { %2735 = vmatpush3.bf16.msra.mxu1 %v2948_v39 }
0x16e9   :  { %2736 = vmatprep.subr.bf16.mxu1 %v3122_v4 }
0x16ec   :  { %2737 = vmatpush3.bf16.msra.mxu1 %v2949_v11 }
0x16ed   :  { %2738 = vmatprep.subr.bf16.mxu1 %v3122_v4 }
0x16f0   :  { %2739 = vmatpush3.bf16.msra.mxu1 %v2950_v12 }
0x16f1   :  { %2740 = vmatprep.subr.bf16.mxu1 %v3122_v4 }
0x16f4   :  { %2741 = vmatpush3.bf16.msra.mxu1 %v2951_v29 }
0x16f5   :  { %2742 = vmatprep.subr.bf16.mxu1 %v3122_v4 }
0x16f8   :  { %2743 = vmatpush3.bf16.msra.mxu1 %v2952_v14 }
0x17ae   :  { %v2181_v34 = vpop.f32.mrb[40].mxu1 }
0x17af   :  { %v2203_v54 = vpack.c.bf16 %v2181_v34, %v2181_v34  ;;  %v2726_v56 = vpop.f32.mrb[41].mxu1 }
0x17b0   :  { %v2184_v16 = vpop.f32.mrb[42].mxu1 }
0x17b1   :  { %v2727_v17 = vpop.f32.mrb[43].mxu1  ;;  %2745 = vmatmul.mubr.bf16.vlgmr.msra.gmra.mrb[44].mxu1 %v2203_v54 }
0x1884   :  { %v2287_v19 = vpop.f32.mrb[44].mxu1 }
0x1885   :  { %v2288_v20 = vadd.f32 %v2287_v19, %v2204_v18  ;;  %v2746_v21 = vpop.f32.mrb[45].mxu1 }
0x1886   :  { %v2290_v22 = vpop.f32.mrb[46].mxu1 }
0x1887   :  { %2293 = vst [vmem:[#allocation8] sm:$0x3] %v2288_v20  ;;  %v2747_v15 = vpop.f32.mrb[47].mxu1 }
0x1888   :  { %3098 = shalt.err (!%p3095_p0)
}
0x1889   :  { %s3099_s11 = scalar_lea.hbm %s3552_s7, 32 }
0x188a   :  { %p3100_p1 = scmp.ne.s32.totalorder %s3552_s7, %s3099_s11  ;;  %p3103_p2 = scmp.lt.u32.totalorder %s3099_s11, %s3552_s7 }
0x188c   :  { %p3105_p3 = pnand %p3103_p2, %p3100_p1 }
0x188e   :  { %3108 = shalt.err (!%p3105_p3)
}
0x188f   :  { %2303 = dma.vmem_to_hbm [thread:$0]  %s2301_s30, 32, %s3552_s7, [#allocation4]  }
0x1890   :  { %3113 = dma.done.wait [#allocation4], 32  }
0x1891   :  { %3114 = vsyncadd [#allocation4], 4294967264 }
0x1892   :  { %2307 = vsyncpa [#allocation3], 1 }
0x1893   :  { %2308 = vsyncpa [#allocation6], 1 }
0x1894   :  { %2309 = vsyncpa [#allocation4], 1 }

</bundles_post_ra>
